<compile_context>
chip_gen: v5e
topology: v5e:2x2
jax: 0.10.0
libtpu: 0.0.40
codegen_flags: <defaults>
</compile_context>

<pallas_src>
import numpy as np
import jax
import jax.numpy as jnp
from jax.experimental import pallas as pl
from jax.experimental.pallas import tpu as pltpu


def _round_up(x, m):
    return ((x + m - 1) // m) * m


def _pick_tile_h(H, W, K, cinp, itemsize, budget_bytes=8 * 1024 * 1024):
    """Largest divisor of H whose (double-buffered) slab + im2col scratch fit."""
    pad = K // 2
    wp = W + 2 * pad
    cap = H
    if H >= 16:                         # keep >=2 row tiles so the prefetch
        cap = min(cap, max(8, H // 2))  # chain actually hides the slab DMA
    cap = min(cap, 64)
    for th in range(cap, 0, -1):
        if H % th:
            continue
        slab = 2 * (th + 2 * pad) * wp * cinp * itemsize     # double buffer
        patches = th * W * K * K * cinp * itemsize
        if slab + patches <= budget_bytes:
            return th
    return 1


def conv2d_forward(x_nchw, weight, bias):
    """EDM Conv2d forward (default config) via Pallas.

    x_nchw : (N, Cin, H, W)
    weight : (Cout, Cin, K, K)
    bias   : (Cout,)
    returns: (N, Cout, H, W)
    """
    N, Cin, H, W = x_nchw.shape
    Cout, Cin_w, K, K2 = weight.shape
    assert Cin_w == Cin and K == K2
    assert K % 2 == 1, "only odd kernel sizes match F.conv2d(padding=K//2)"
    pad = K // 2
    dtype = x_nchw.dtype
    itemsize = jnp.dtype(dtype).itemsize

    # ---- tiling choices ------------------------------------------------------
    cinp = _round_up(Cin, 128)            # lane-dense contraction channels
    coutp = _round_up(Cout, 128)          # lane-dense output channels
    tco = 256 if coutp % 256 == 0 else 128
    th = _pick_tile_h(H, W, K, cinp, itemsize)
    num_h = H // th
    num_co = coutp // tco
    wp = W + 2 * pad
    kkcin = K * K * cinp

    # ---- plain-JAX glue: layout + padding (fuses into one copy) --------------
    x_nhwc = jnp.transpose(x_nchw, (0, 2, 3, 1))                       # NHWC
    x_padded = jnp.pad(
        x_nhwc, ((0, 0), (pad, pad), (pad, pad), (0, cinp - Cin)))     # (N,Hp,Wp,Cinp)

    w = jnp.transpose(weight.astype(dtype), (2, 3, 1, 0))              # (K,K,Cin,Cout)
    w = jnp.pad(w, ((0, 0), (0, 0), (0, cinp - Cin), (0, coutp - Cout)))
    w2d = w.reshape(kkcin, coutp)                                      # im2col weights
    b2d = jnp.pad(bias.astype(dtype), (0, coutp - Cout)).reshape(1, coutp)

    # ---- kernel --------------------------------------------------------------
    def kernel(x_hbm, w_ref, b_ref, o_ref, xslab, patches, sem):
        n = pl.program_id(0)
        h = pl.program_id(1)
        co = pl.program_id(2)
        slot = h % 2

        def slab_copy(row_tile, s):
            start = pl.multiple_of(row_tile * th, th)
            return pltpu.make_async_copy(
                x_hbm.at[n, pl.ds(start, th + 2 * pad)],
                xslab.at[s], sem.at[s])

        @pl.when(co == 0)
        def _():
            # Prime: the first row tile of every image fetches its own slab.
            @pl.when(h == 0)
            def _():
                slab_copy(0, 0).start()

            # Prefetch the next row tile's slab into the other slot.  It flies
            # while this tile's patches are built and its Cout tiles matmul.
            # The chain only spans the "arbitrary" h axis (core-local), so it
            # is safe under megacore sharding of the batch axis.
            @pl.when(h + 1 < num_h)
            def _():
                slab_copy(h + 1, 1 - slot).start()

            # Wait for this tile's slab (started above for h==0, else at h-1).
            slab_copy(h, slot).wait()

            # Build im2col patches (tH*W, K*K*Cinp) once; reused by every
            # Cout tile.  Static slot index per branch keeps slicing static.
            def build_patches(s):
                for kh in range(K):
                    for kw in range(K):
                        t = kh * K + kw
                        tap = xslab[s, kh:kh + th, kw:kw + W, :]       # (tH,W,Cinp)
                        patches[:, t * cinp:(t + 1) * cinp] = (
                            tap.reshape(th * W, cinp))

            @pl.when(slot == 0)
            def _():
                build_patches(0)

            @pl.when(slot == 1)
            def _():
                build_patches(1)

        # One big MXU matmul per Cout tile: contraction = K*K*Cinp, f32 acc.
        acc = jnp.dot(patches[...], w_ref[...],
                      preferred_element_type=jnp.float32)
        acc = acc + b_ref[0, :].astype(jnp.float32)
        o_ref[0] = acc.reshape(th, W, tco).astype(o_ref.dtype)

    # ---- VMEM budget (sized against v7x's 64 MiB physical VMEM) --------------
    slab_bytes = 2 * (th + 2 * pad) * wp * cinp * itemsize
    patches_bytes = th * W * kkcin * itemsize
    w_tile_bytes = kkcin * tco * itemsize
    out_tile_bytes = th * W * tco * itemsize
    bias_tile_bytes = tco * itemsize
    vmem_need = (slab_bytes + patches_bytes
                 + 2 * (w_tile_bytes + out_tile_bytes + bias_tile_bytes))
    vmem_limit = int(min(max(vmem_need + (8 << 20), 32 << 20), 64 << 20))

    cost = pl.CostEstimate(
        flops=2 * N * H * W * K * K * Cin * Cout,
        transcendentals=0,
        bytes_accessed=int((x_nchw.size + weight.size + bias.size
                            + N * Cout * H * W) * itemsize))

    out = pl.pallas_call(
        kernel,
        out_shape=jax.ShapeDtypeStruct((N, H, W, coutp), dtype),
        grid_spec=pltpu.PrefetchScalarGridSpec(
            num_scalar_prefetch=0,
            grid=(N, num_h, num_co),
            in_specs=[
                pl.BlockSpec(memory_space=pl.ANY),                     # x stays in HBM
                pl.BlockSpec((kkcin, tco), lambda n, h, co: (0, co)),  # weight tile
                pl.BlockSpec((1, tco), lambda n, h, co: (0, co)),      # bias tile
            ],
            out_specs=pl.BlockSpec((1, th, W, tco),
                                   lambda n, h, co: (n, h, 0, co)),
            scratch_shapes=[
                pltpu.VMEM((2, th + 2 * pad, wp, cinp), dtype),        # slab x2 (dbl buf)
                pltpu.VMEM((th * W, kkcin), dtype),                    # im2col patches
                pltpu.SemaphoreType.DMA((2,)),                         # slab DMA sems
            ],
        ),
        compiler_params=pltpu.CompilerParams(
            dimension_semantics=("parallel", "arbitrary", "arbitrary"),
            vmem_limit_bytes=vmem_limit),
        cost_estimate=cost,
    )(x_padded, w2d, b2d)

    out = out[..., :Cout]                                              # drop channel pad
    return jnp.transpose(out, (0, 3, 1, 2))                           # back to NCHW


def init_params(key, in_channels, out_channels, kernel,
                init_mode="kaiming_normal", init_weight=1.0, init_bias=0.0):
    """Deterministic re-implementation of weight_init for the default config."""
    fan_in = in_channels * kernel * kernel
    kw, kb = jax.random.split(key)
    assert init_mode == "kaiming_normal"
    w = np.sqrt(1.0 / fan_in) * jax.random.normal(
        kw, (out_channels, in_channels, kernel, kernel), dtype=jnp.float32)
    b = np.sqrt(1.0 / fan_in) * jax.random.normal(
        kb, (out_channels,), dtype=jnp.float32)
    return w * init_weight, b * init_bias


if __name__ == "__main__":
    key = jax.random.PRNGKey(0)
    k_x, k_p = jax.random.split(key)

    N, Cin, Cout, H, W, K = 2, 4, 8, 16, 16, 3
    x = jax.random.normal(k_x, (N, Cin, H, W), dtype=jnp.float32)
    # init_bias=1.0 so the bias-add path is actually exercised in the check.
    weight, bias = init_params(k_p, Cin, Cout, K, init_bias=1.0)

    y = conv2d_forward(x, weight, bias)
    y = jax.block_until_ready(y)

    # Reference: XLA conv with same semantics as F.conv2d(padding=K//2) + bias.
    y_ref = jax.lax.conv_general_dilated(
        x, weight, window_strides=(1, 1),
        padding=((K // 2,) * 2, (K // 2,) * 2),
        dimension_numbers=("NCHW", "OIHW", "NCHW")) + bias.reshape(1, -1, 1, 1)
    assert y.shape == (N, Cout, H, W)
    assert jnp.allclose(y, y_ref, rtol=1e-5, atol=1e-5), \
        float(jnp.max(jnp.abs(y - y_ref)))

    # bf16 operand path (v6e/v7x MXU): same kernel, operand dtype follows x.
    y_bf16 = conv2d_forward(x.astype(jnp.bfloat16),
                            weight.astype(jnp.bfloat16),
                            bias.astype(jnp.bfloat16))
    y_bf16 = jax.block_until_ready(y_bf16).astype(jnp.float32)
    assert jnp.allclose(y_bf16, y_ref, rtol=1e-1, atol=1e-1), \
        float(jnp.max(jnp.abs(y_bf16 - y_ref)))

    print("KERNEL_OK")
</pallas_src>

<mosaic_0001>
module attributes {stable_mosaic.version = 11 : i64} {
  func.func @kernel(%arg0: i32, %arg1: i32, %arg2: i32, %arg3: memref<2x18x18x128xf32, #tpu.memory_space<any>>, %arg4: memref<1152x128xf32, #tpu.memory_space<vmem>>, %arg5: memref<1x128xf32, #tpu.memory_space<vmem>>, %arg6: memref<1x8x16x128xf32, #tpu.memory_space<vmem>>, %arg7: memref<2x10x18x128xf32, #tpu.memory_space<vmem>>, %arg8: memref<128x1152xf32, #tpu.memory_space<vmem>>, %arg9: memref<2x!tpu.dma_semaphore, #tpu.memory_space<semaphore_mem>>) attributes {dimension_semantics = [#tpu.dimension_semantics<parallel>, #tpu.dimension_semantics<arbitrary>, #tpu.dimension_semantics<arbitrary>], iteration_bounds = array<i64: 2, 2, 1>, scalar_prefetch = 0 : i64, scratch_operands = 3 : i64, tpu.core_type = #tpu.core_type<tc>, window_params = [{}, {transform_indices = @transform_1, window_bounds = array<i64: 1152, 128>}, {transform_indices = @transform_2, window_bounds = array<i64: 1, 128>}, {transform_indices = @transform_3, window_bounds = array<i64: 1, 8, 16, 128>}]} {
    %c2_i32 = arith.constant 2 : i32
    %c0_i32 = arith.constant 0 : i32
    %0 = arith.cmpi eq, %c2_i32, %c0_i32 : i32
    %c1_i32 = arith.constant 1 : i32
    %1 = arith.select %0, %c1_i32, %c2_i32 : i32
    %2 = arith.remsi %arg1, %1 : i32
    %c0_i32_0 = arith.constant 0 : i32
    %3 = arith.cmpi ne, %2, %c0_i32_0 : i32
    %c0_i32_1 = arith.constant 0 : i32
    %4 = arith.cmpi slt, %2, %c0_i32_1 : i32
    %c0_i32_2 = arith.constant 0 : i32
    %5 = arith.cmpi slt, %1, %c0_i32_2 : i32
    %6 = arith.xori %4, %5 : i1
    %7 = arith.andi %6, %3 : i1
    %8 = arith.addi %2, %1 : i32
    %9 = arith.select %7, %8, %2 : i32
    %c0_i32_3 = arith.constant 0 : i32
    %10 = arith.cmpi eq, %arg2, %c0_i32_3 : i32
    %11 = arith.extui %10 : i1 to i32
    %c0_i32_4 = arith.constant 0 : i32
    %12 = arith.cmpi ne, %11, %c0_i32_4 : i32
    scf.if %12 {
      %c0_i32_14 = arith.constant 0 : i32
      %25 = arith.cmpi eq, %arg1, %c0_i32_14 : i32
      %26 = arith.extui %25 : i1 to i32
      %c0_i32_15 = arith.constant 0 : i32
      %27 = arith.cmpi ne, %26, %c0_i32_15 : i32
      scf.if %27 {
        %c0_i32_28 = arith.constant 0 : i32
        %46 = tpu.assume_multiple %c0_i32_28, 8 : i32
        %c0_i32_29 = arith.constant 0 : i32
        %c0_i32_30 = arith.constant 0 : i32
        %c0_i32_31 = arith.constant 0 : i32
        %c0_i32_32 = arith.constant 0 : i32
        %47 = tpu.memref_slice %arg3[%arg0, %46, %c0_i32_31, %c0_i32_32] : memref<2x18x18x128xf32, #tpu.memory_space<any>> -> memref<1x10x18x128xf32, #tpu.memory_space<any>>
        %48 = tpu.memref_squeeze %47 : memref<1x10x18x128xf32, #tpu.memory_space<any>> -> memref<10x18x128xf32, #tpu.memory_space<any>>
        %c0_i32_33 = arith.constant 0 : i32
        %c0_i32_34 = arith.constant 0 : i32
        %c0_i32_35 = arith.constant 0 : i32
        %49 = tpu.memref_slice %arg7[%c0_i32_29, %c0_i32_33, %c0_i32_34, %c0_i32_35] : memref<2x10x18x128xf32, #tpu.memory_space<vmem>> -> memref<1x10x18x128xf32, #tpu.memory_space<vmem>>
        %50 = tpu.memref_squeeze %49 : memref<1x10x18x128xf32, #tpu.memory_space<vmem>> -> memref<10x18x128xf32, #tpu.memory_space<vmem>>
        %51 = tpu.memref_slice %arg9[%c0_i32_30] : memref<2x!tpu.dma_semaphore, #tpu.memory_space<semaphore_mem>> -> memref<1x!tpu.dma_semaphore, #tpu.memory_space<semaphore_mem>>
        %52 = tpu.memref_squeeze %51 : memref<1x!tpu.dma_semaphore, #tpu.memory_space<semaphore_mem>> -> memref<!tpu.dma_semaphore, #tpu.memory_space<semaphore_mem>>
        tpu.enqueue_dma source(%48 : memref<10x18x128xf32, #tpu.memory_space<any>>) target(%50 : memref<10x18x128xf32, #tpu.memory_space<vmem>>) target_semaphore(%52 : memref<!tpu.dma_semaphore, #tpu.memory_space<semaphore_mem>>)
      } else {
      }
      %c1_i32_16 = arith.constant 1 : i32
      %28 = arith.addi %arg1, %c1_i32_16 : i32
      %c2_i32_17 = arith.constant 2 : i32
      %29 = arith.cmpi slt, %28, %c2_i32_17 : i32
      %30 = arith.extui %29 : i1 to i32
      %c0_i32_18 = arith.constant 0 : i32
      %31 = arith.cmpi ne, %30, %c0_i32_18 : i32
      scf.if %31 {
        %c1_i32_28 = arith.constant 1 : i32
        %46 = arith.addi %arg1, %c1_i32_28 : i32
        %c1_i32_29 = arith.constant 1 : i32
        %47 = arith.subi %c1_i32_29, %9 : i32
        %c8_i32_30 = arith.constant 8 : i32
        %48 = arith.muli %46, %c8_i32_30 : i32
        %49 = tpu.assume_multiple %48, 8 : i32
        %c0_i32_31 = arith.constant 0 : i32
        %c0_i32_32 = arith.constant 0 : i32
        %50 = tpu.memref_slice %arg3[%arg0, %49, %c0_i32_31, %c0_i32_32] : memref<2x18x18x128xf32, #tpu.memory_space<any>> -> memref<1x10x18x128xf32, #tpu.memory_space<any>>
        %51 = tpu.memref_squeeze %50 : memref<1x10x18x128xf32, #tpu.memory_space<any>> -> memref<10x18x128xf32, #tpu.memory_space<any>>
        %c0_i32_33 = arith.constant 0 : i32
        %c0_i32_34 = arith.constant 0 : i32
        %c0_i32_35 = arith.constant 0 : i32
        %52 = tpu.memref_slice %arg7[%47, %c0_i32_33, %c0_i32_34, %c0_i32_35] : memref<2x10x18x128xf32, #tpu.memory_space<vmem>> -> memref<1x10x18x128xf32, #tpu.memory_space<vmem>>
        %53 = tpu.memref_squeeze %52 : memref<1x10x18x128xf32, #tpu.memory_space<vmem>> -> memref<10x18x128xf32, #tpu.memory_space<vmem>>
        %54 = tpu.memref_slice %arg9[%47] : memref<2x!tpu.dma_semaphore, #tpu.memory_space<semaphore_mem>> -> memref<1x!tpu.dma_semaphore, #tpu.memory_space<semaphore_mem>>
        %55 = tpu.memref_squeeze %54 : memref<1x!tpu.dma_semaphore, #tpu.memory_space<semaphore_mem>> -> memref<!tpu.dma_semaphore, #tpu.memory_space<semaphore_mem>>
        tpu.enqueue_dma source(%51 : memref<10x18x128xf32, #tpu.memory_space<any>>) target(%53 : memref<10x18x128xf32, #tpu.memory_space<vmem>>) target_semaphore(%55 : memref<!tpu.dma_semaphore, #tpu.memory_space<semaphore_mem>>)
      } else {
      }
      %c8_i32 = arith.constant 8 : i32
      %32 = arith.muli %arg1, %c8_i32 : i32
      %33 = tpu.assume_multiple %32, 8 : i32
      %c0_i32_19 = arith.constant 0 : i32
      %c0_i32_20 = arith.constant 0 : i32
      %34 = tpu.memref_slice %arg3[%arg0, %33, %c0_i32_19, %c0_i32_20] : memref<2x18x18x128xf32, #tpu.memory_space<any>> -> memref<1x10x18x128xf32, #tpu.memory_space<any>>
      %35 = tpu.memref_squeeze %34 : memref<1x10x18x128xf32, #tpu.memory_space<any>> -> memref<10x18x128xf32, #tpu.memory_space<any>>
      %c0_i32_21 = arith.constant 0 : i32
      %c0_i32_22 = arith.constant 0 : i32
      %c0_i32_23 = arith.constant 0 : i32
      %36 = tpu.memref_slice %arg7[%9, %c0_i32_21, %c0_i32_22, %c0_i32_23] : memref<2x10x18x128xf32, #tpu.memory_space<vmem>> -> memref<1x10x18x128xf32, #tpu.memory_space<vmem>>
      %37 = tpu.memref_squeeze %36 : memref<1x10x18x128xf32, #tpu.memory_space<vmem>> -> memref<10x18x128xf32, #tpu.memory_space<vmem>>
      %38 = tpu.memref_slice %arg9[%9] : memref<2x!tpu.dma_semaphore, #tpu.memory_space<semaphore_mem>> -> memref<1x!tpu.dma_semaphore, #tpu.memory_space<semaphore_mem>>
      %39 = tpu.memref_squeeze %38 : memref<1x!tpu.dma_semaphore, #tpu.memory_space<semaphore_mem>> -> memref<!tpu.dma_semaphore, #tpu.memory_space<semaphore_mem>>
      tpu.wait_dma2 semaphore(%39 : memref<!tpu.dma_semaphore, #tpu.memory_space<semaphore_mem>>) src(%35 : memref<10x18x128xf32, #tpu.memory_space<any>>) dst(%37 : memref<10x18x128xf32, #tpu.memory_space<vmem>>)
      %c0_i32_24 = arith.constant 0 : i32
      %40 = arith.cmpi eq, %9, %c0_i32_24 : i32
      %41 = arith.extui %40 : i1 to i32
      %c0_i32_25 = arith.constant 0 : i32
      %42 = arith.cmpi ne, %41, %c0_i32_25 : i32
      scf.if %42 {
        %c0_28 = arith.constant 0 : index
        %c0_29 = arith.constant 0 : index
        %c0_30 = arith.constant 0 : index
        %c0_31 = arith.constant 0 : index
        %46 = vector.load %arg7[%c0_28, %c0_29, %c0_30, %c0_31] : memref<2x10x18x128xf32, #tpu.memory_space<vmem>>, vector<1x8x16x128xf32>
        %47 = vector.shape_cast %46 : vector<1x8x16x128xf32> to vector<8x16x128xf32>
        %48 = vector.shape_cast %47 : vector<8x16x128xf32> to vector<128x128xf32>
        %c0_32 = arith.constant 0 : index
        %c0_33 = arith.constant 0 : index
        %49 = vector.load %arg8[%c0_32, %c0_33] : memref<128x1152xf32, #tpu.memory_space<vmem>>, vector<128x128xf32>
        tpu.vector_store %arg8[%c0_32, %c0_33], %48 {strides = array<i32>} : memref<128x1152xf32, #tpu.memory_space<vmem>>, vector<128x128xf32>,
        %c0_34 = arith.constant 0 : index
        %c0_35 = arith.constant 0 : index
        %c1 = arith.constant 1 : index
        %c0_36 = arith.constant 0 : index
        %50 = vector.load %arg7[%c0_34, %c0_35, %c1, %c0_36] : memref<2x10x18x128xf32, #tpu.memory_space<vmem>>, vector<1x8x16x128xf32>
        %51 = vector.shape_cast %50 : vector<1x8x16x128xf32> to vector<8x16x128xf32>
        %52 = vector.shape_cast %51 : vector<8x16x128xf32> to vector<128x128xf32>
        %c0_37 = arith.constant 0 : index
        %c128 = arith.constant 128 : index
        %53 = vector.load %arg8[%c0_37, %c128] : memref<128x1152xf32, #tpu.memory_space<vmem>>, vector<128x128xf32>
        tpu.vector_store %arg8[%c0_37, %c128], %52 {strides = array<i32>} : memref<128x1152xf32, #tpu.memory_space<vmem>>, vector<128x128xf32>,
        %c0_38 = arith.constant 0 : index
        %c0_39 = arith.constant 0 : index
        %c2 = arith.constant 2 : index
        %c0_40 = arith.constant 0 : index
        %54 = vector.load %arg7[%c0_38, %c0_39, %c2, %c0_40] : memref<2x10x18x128xf32, #tpu.memory_space<vmem>>, vector<1x8x16x128xf32>
        %55 = vector.shape_cast %54 : vector<1x8x16x128xf32> to vector<8x16x128xf32>
        %56 = vector.shape_cast %55 : vector<8x16x128xf32> to vector<128x128xf32>
        %c0_41 = arith.constant 0 : index
        %c256 = arith.constant 256 : index
        %57 = vector.load %arg8[%c0_41, %c256] : memref<128x1152xf32, #tpu.memory_space<vmem>>, vector<128x128xf32>
        tpu.vector_store %arg8[%c0_41, %c256], %56 {strides = array<i32>} : memref<128x1152xf32, #tpu.memory_space<vmem>>, vector<128x128xf32>,
        %c0_42 = arith.constant 0 : index
        %c1_43 = arith.constant 1 : index
        %c0_44 = arith.constant 0 : index
        %c0_45 = arith.constant 0 : index
        %58 = vector.load %arg7[%c0_42, %c1_43, %c0_44, %c0_45] : memref<2x10x18x128xf32, #tpu.memory_space<vmem>>, vector<1x8x16x128xf32>
        %59 = vector.shape_cast %58 : vector<1x8x16x128xf32> to vector<8x16x128xf32>
        %60 = vector.shape_cast %59 : vector<8x16x128xf32> to vector<128x128xf32>
        %c0_46 = arith.constant 0 : index
        %c384 = arith.constant 384 : index
        %61 = vector.load %arg8[%c0_46, %c384] : memref<128x1152xf32, #tpu.memory_space<vmem>>, vector<128x128xf32>
        tpu.vector_store %arg8[%c0_46, %c384], %60 {strides = array<i32>} : memref<128x1152xf32, #tpu.memory_space<vmem>>, vector<128x128xf32>,
        %c0_47 = arith.constant 0 : index
        %c1_48 = arith.constant 1 : index
        %c1_49 = arith.constant 1 : index
        %c0_50 = arith.constant 0 : index
        %62 = vector.load %arg7[%c0_47, %c1_48, %c1_49, %c0_50] : memref<2x10x18x128xf32, #tpu.memory_space<vmem>>, vector<1x8x16x128xf32>
        %63 = vector.shape_cast %62 : vector<1x8x16x128xf32> to vector<8x16x128xf32>
        %64 = vector.shape_cast %63 : vector<8x16x128xf32> to vector<128x128xf32>
        %c0_51 = arith.constant 0 : index
        %c512 = arith.constant 512 : index
        %65 = vector.load %arg8[%c0_51, %c512] : memref<128x1152xf32, #tpu.memory_space<vmem>>, vector<128x128xf32>
        tpu.vector_store %arg8[%c0_51, %c512], %64 {strides = array<i32>} : memref<128x1152xf32, #tpu.memory_space<vmem>>, vector<128x128xf32>,
        %c0_52 = arith.constant 0 : index
        %c1_53 = arith.constant 1 : index
        %c2_54 = arith.constant 2 : index
        %c0_55 = arith.constant 0 : index
        %66 = vector.load %arg7[%c0_52, %c1_53, %c2_54, %c0_55] : memref<2x10x18x128xf32, #tpu.memory_space<vmem>>, vector<1x8x16x128xf32>
        %67 = vector.shape_cast %66 : vector<1x8x16x128xf32> to vector<8x16x128xf32>
        %68 = vector.shape_cast %67 : vector<8x16x128xf32> to vector<128x128xf32>
        %c0_56 = arith.constant 0 : index
        %c640 = arith.constant 640 : index
        %69 = vector.load %arg8[%c0_56, %c640] : memref<128x1152xf32, #tpu.memory_space<vmem>>, vector<128x128xf32>
        tpu.vector_store %arg8[%c0_56, %c640], %68 {strides = array<i32>} : memref<128x1152xf32, #tpu.memory_space<vmem>>, vector<128x128xf32>,
        %c0_57 = arith.constant 0 : index
        %c2_58 = arith.constant 2 : index
        %c0_59 = arith.constant 0 : index
        %c0_60 = arith.constant 0 : index
        %70 = vector.load %arg7[%c0_57, %c2_58, %c0_59, %c0_60] : memref<2x10x18x128xf32, #tpu.memory_space<vmem>>, vector<1x8x16x128xf32>
        %71 = vector.shape_cast %70 : vector<1x8x16x128xf32> to vector<8x16x128xf32>
        %72 = vector.shape_cast %71 : vector<8x16x128xf32> to vector<128x128xf32>
        %c0_61 = arith.constant 0 : index
        %c768 = arith.constant 768 : index
        %73 = vector.load %arg8[%c0_61, %c768] : memref<128x1152xf32, #tpu.memory_space<vmem>>, vector<128x128xf32>
        tpu.vector_store %arg8[%c0_61, %c768], %72 {strides = array<i32>} : memref<128x1152xf32, #tpu.memory_space<vmem>>, vector<128x128xf32>,
        %c0_62 = arith.constant 0 : index
        %c2_63 = arith.constant 2 : index
        %c1_64 = arith.constant 1 : index
        %c0_65 = arith.constant 0 : index
        %74 = vector.load %arg7[%c0_62, %c2_63, %c1_64, %c0_65] : memref<2x10x18x128xf32, #tpu.memory_space<vmem>>, vector<1x8x16x128xf32>
        %75 = vector.shape_cast %74 : vector<1x8x16x128xf32> to vector<8x16x128xf32>
        %76 = vector.shape_cast %75 : vector<8x16x128xf32> to vector<128x128xf32>
        %c0_66 = arith.constant 0 : index
        %c896 = arith.constant 896 : index
        %77 = vector.load %arg8[%c0_66, %c896] : memref<128x1152xf32, #tpu.memory_space<vmem>>, vector<128x128xf32>
        tpu.vector_store %arg8[%c0_66, %c896], %76 {strides = array<i32>} : memref<128x1152xf32, #tpu.memory_space<vmem>>, vector<128x128xf32>,
        %c0_67 = arith.constant 0 : index
        %c2_68 = arith.constant 2 : index
        %c2_69 = arith.constant 2 : index
        %c0_70 = arith.constant 0 : index
        %78 = vector.load %arg7[%c0_67, %c2_68, %c2_69, %c0_70] : memref<2x10x18x128xf32, #tpu.memory_space<vmem>>, vector<1x8x16x128xf32>
        %79 = vector.shape_cast %78 : vector<1x8x16x128xf32> to vector<8x16x128xf32>
        %80 = vector.shape_cast %79 : vector<8x16x128xf32> to vector<128x128xf32>
        %c0_71 = arith.constant 0 : index
        %c1024 = arith.constant 1024 : index
        %81 = vector.load %arg8[%c0_71, %c1024] : memref<128x1152xf32, #tpu.memory_space<vmem>>, vector<128x128xf32>
        tpu.vector_store %arg8[%c0_71, %c1024], %80 {strides = array<i32>} : memref<128x1152xf32, #tpu.memory_space<vmem>>, vector<128x128xf32>,
      } else {
      }
      %c1_i32_26 = arith.constant 1 : i32
      %43 = arith.cmpi eq, %9, %c1_i32_26 : i32
      %44 = arith.extui %43 : i1 to i32
      %c0_i32_27 = arith.constant 0 : i32
      %45 = arith.cmpi ne, %44, %c0_i32_27 : i32
      scf.if %45 {
        %c1 = arith.constant 1 : index
        %c0_28 = arith.constant 0 : index
        %c0_29 = arith.constant 0 : index
        %c0_30 = arith.constant 0 : index
        %46 = vector.load %arg7[%c1, %c0_28, %c0_29, %c0_30] : memref<2x10x18x128xf32, #tpu.memory_space<vmem>>, vector<1x8x16x128xf32>
        %47 = vector.shape_cast %46 : vector<1x8x16x128xf32> to vector<8x16x128xf32>
        %48 = vector.shape_cast %47 : vector<8x16x128xf32> to vector<128x128xf32>
        %c0_31 = arith.constant 0 : index
        %c0_32 = arith.constant 0 : index
        %49 = vector.load %arg8[%c0_31, %c0_32] : memref<128x1152xf32, #tpu.memory_space<vmem>>, vector<128x128xf32>
        tpu.vector_store %arg8[%c0_31, %c0_32], %48 {strides = array<i32>} : memref<128x1152xf32, #tpu.memory_space<vmem>>, vector<128x128xf32>,
        %c1_33 = arith.constant 1 : index
        %c0_34 = arith.constant 0 : index
        %c1_35 = arith.constant 1 : index
        %c0_36 = arith.constant 0 : index
        %50 = vector.load %arg7[%c1_33, %c0_34, %c1_35, %c0_36] : memref<2x10x18x128xf32, #tpu.memory_space<vmem>>, vector<1x8x16x128xf32>
        %51 = vector.shape_cast %50 : vector<1x8x16x128xf32> to vector<8x16x128xf32>
        %52 = vector.shape_cast %51 : vector<8x16x128xf32> to vector<128x128xf32>
        %c0_37 = arith.constant 0 : index
        %c128 = arith.constant 128 : index
        %53 = vector.load %arg8[%c0_37, %c128] : memref<128x1152xf32, #tpu.memory_space<vmem>>, vector<128x128xf32>
        tpu.vector_store %arg8[%c0_37, %c128], %52 {strides = array<i32>} : memref<128x1152xf32, #tpu.memory_space<vmem>>, vector<128x128xf32>,
        %c1_38 = arith.constant 1 : index
        %c0_39 = arith.constant 0 : index
        %c2 = arith.constant 2 : index
        %c0_40 = arith.constant 0 : index
        %54 = vector.load %arg7[%c1_38, %c0_39, %c2, %c0_40] : memref<2x10x18x128xf32, #tpu.memory_space<vmem>>, vector<1x8x16x128xf32>
        %55 = vector.shape_cast %54 : vector<1x8x16x128xf32> to vector<8x16x128xf32>
        %56 = vector.shape_cast %55 : vector<8x16x128xf32> to vector<128x128xf32>
        %c0_41 = arith.constant 0 : index
        %c256 = arith.constant 256 : index
        %57 = vector.load %arg8[%c0_41, %c256] : memref<128x1152xf32, #tpu.memory_space<vmem>>, vector<128x128xf32>
        tpu.vector_store %arg8[%c0_41, %c256], %56 {strides = array<i32>} : memref<128x1152xf32, #tpu.memory_space<vmem>>, vector<128x128xf32>,
        %c1_42 = arith.constant 1 : index
        %c1_43 = arith.constant 1 : index
        %c0_44 = arith.constant 0 : index
        %c0_45 = arith.constant 0 : index
        %58 = vector.load %arg7[%c1_42, %c1_43, %c0_44, %c0_45] : memref<2x10x18x128xf32, #tpu.memory_space<vmem>>, vector<1x8x16x128xf32>
        %59 = vector.shape_cast %58 : vector<1x8x16x128xf32> to vector<8x16x128xf32>
        %60 = vector.shape_cast %59 : vector<8x16x128xf32> to vector<128x128xf32>
        %c0_46 = arith.constant 0 : index
        %c384 = arith.constant 384 : index
        %61 = vector.load %arg8[%c0_46, %c384] : memref<128x1152xf32, #tpu.memory_space<vmem>>, vector<128x128xf32>
        tpu.vector_store %arg8[%c0_46, %c384], %60 {strides = array<i32>} : memref<128x1152xf32, #tpu.memory_space<vmem>>, vector<128x128xf32>,
        %c1_47 = arith.constant 1 : index
        %c1_48 = arith.constant 1 : index
        %c1_49 = arith.constant 1 : index
        %c0_50 = arith.constant 0 : index
        %62 = vector.load %arg7[%c1_47, %c1_48, %c1_49, %c0_50] : memref<2x10x18x128xf32, #tpu.memory_space<vmem>>, vector<1x8x16x128xf32>
        %63 = vector.shape_cast %62 : vector<1x8x16x128xf32> to vector<8x16x128xf32>
        %64 = vector.shape_cast %63 : vector<8x16x128xf32> to vector<128x128xf32>
        %c0_51 = arith.constant 0 : index
        %c512 = arith.constant 512 : index
        %65 = vector.load %arg8[%c0_51, %c512] : memref<128x1152xf32, #tpu.memory_space<vmem>>, vector<128x128xf32>
        tpu.vector_store %arg8[%c0_51, %c512], %64 {strides = array<i32>} : memref<128x1152xf32, #tpu.memory_space<vmem>>, vector<128x128xf32>,
        %c1_52 = arith.constant 1 : index
        %c1_53 = arith.constant 1 : index
        %c2_54 = arith.constant 2 : index
        %c0_55 = arith.constant 0 : index
        %66 = vector.load %arg7[%c1_52, %c1_53, %c2_54, %c0_55] : memref<2x10x18x128xf32, #tpu.memory_space<vmem>>, vector<1x8x16x128xf32>
        %67 = vector.shape_cast %66 : vector<1x8x16x128xf32> to vector<8x16x128xf32>
        %68 = vector.shape_cast %67 : vector<8x16x128xf32> to vector<128x128xf32>
        %c0_56 = arith.constant 0 : index
        %c640 = arith.constant 640 : index
        %69 = vector.load %arg8[%c0_56, %c640] : memref<128x1152xf32, #tpu.memory_space<vmem>>, vector<128x128xf32>
        tpu.vector_store %arg8[%c0_56, %c640], %68 {strides = array<i32>} : memref<128x1152xf32, #tpu.memory_space<vmem>>, vector<128x128xf32>,
        %c1_57 = arith.constant 1 : index
        %c2_58 = arith.constant 2 : index
        %c0_59 = arith.constant 0 : index
        %c0_60 = arith.constant 0 : index
        %70 = vector.load %arg7[%c1_57, %c2_58, %c0_59, %c0_60] : memref<2x10x18x128xf32, #tpu.memory_space<vmem>>, vector<1x8x16x128xf32>
        %71 = vector.shape_cast %70 : vector<1x8x16x128xf32> to vector<8x16x128xf32>
        %72 = vector.shape_cast %71 : vector<8x16x128xf32> to vector<128x128xf32>
        %c0_61 = arith.constant 0 : index
        %c768 = arith.constant 768 : index
        %73 = vector.load %arg8[%c0_61, %c768] : memref<128x1152xf32, #tpu.memory_space<vmem>>, vector<128x128xf32>
        tpu.vector_store %arg8[%c0_61, %c768], %72 {strides = array<i32>} : memref<128x1152xf32, #tpu.memory_space<vmem>>, vector<128x128xf32>,
        %c1_62 = arith.constant 1 : index
        %c2_63 = arith.constant 2 : index
        %c1_64 = arith.constant 1 : index
        %c0_65 = arith.constant 0 : index
        %74 = vector.load %arg7[%c1_62, %c2_63, %c1_64, %c0_65] : memref<2x10x18x128xf32, #tpu.memory_space<vmem>>, vector<1x8x16x128xf32>
        %75 = vector.shape_cast %74 : vector<1x8x16x128xf32> to vector<8x16x128xf32>
        %76 = vector.shape_cast %75 : vector<8x16x128xf32> to vector<128x128xf32>
        %c0_66 = arith.constant 0 : index
        %c896 = arith.constant 896 : index
        %77 = vector.load %arg8[%c0_66, %c896] : memref<128x1152xf32, #tpu.memory_space<vmem>>, vector<128x128xf32>
        tpu.vector_store %arg8[%c0_66, %c896], %76 {strides = array<i32>} : memref<128x1152xf32, #tpu.memory_space<vmem>>, vector<128x128xf32>,
        %c1_67 = arith.constant 1 : index
        %c2_68 = arith.constant 2 : index
        %c2_69 = arith.constant 2 : index
        %c0_70 = arith.constant 0 : index
        %78 = vector.load %arg7[%c1_67, %c2_68, %c2_69, %c0_70] : memref<2x10x18x128xf32, #tpu.memory_space<vmem>>, vector<1x8x16x128xf32>
        %79 = vector.shape_cast %78 : vector<1x8x16x128xf32> to vector<8x16x128xf32>
        %80 = vector.shape_cast %79 : vector<8x16x128xf32> to vector<128x128xf32>
        %c0_71 = arith.constant 0 : index
        %c1024 = arith.constant 1024 : index
        %81 = vector.load %arg8[%c0_71, %c1024] : memref<128x1152xf32, #tpu.memory_space<vmem>>, vector<128x128xf32>
        tpu.vector_store %arg8[%c0_71, %c1024], %80 {strides = array<i32>} : memref<128x1152xf32, #tpu.memory_space<vmem>>, vector<128x128xf32>,
      } else {
      }
    } else {
    }
    %c0 = arith.constant 0 : index
    %c0_5 = arith.constant 0 : index
    %13 = vector.load %arg8[%c0, %c0_5] : memref<128x1152xf32, #tpu.memory_space<vmem>>, vector<128x1152xf32>
    %c0_6 = arith.constant 0 : index
    %c0_7 = arith.constant 0 : index
    %14 = vector.load %arg4[%c0_6, %c0_7] : memref<1152x128xf32, #tpu.memory_space<vmem>>, vector<1152x128xf32>
    %cst = arith.constant dense<0.000000e+00> : vector<128x128xf32>
    %15 = tpu.matmul %13, %14, %cst {dimension_numbers = #tpu.dot_dimension_numbers<[1], [0], [0], [1], [0, 0, 1, 1], [], []>} : vector<128x1152xf32>, vector<1152x128xf32>, vector<128x128xf32> -> vector<128x128xf32>
    %c0_8 = arith.constant 0 : index
    %c0_9 = arith.constant 0 : index
    %16 = vector.load %arg5[%c0_8, %c0_9] : memref<1x128xf32, #tpu.memory_space<vmem>>, vector<1x128xf32>
    %17 = vector.shape_cast %16 : vector<1x128xf32> to vector<128xf32>
    %18 = vector.shape_cast %17 : vector<128xf32> to vector<1x128xf32>
    %19 = vector.broadcast %18 : vector<1x128xf32> to vector<128x128xf32>
    %20 = arith.addf %15, %19 : vector<128x128xf32>
    %21 = vector.shape_cast %20 : vector<128x128xf32> to vector<8x16x128xf32>
    %c0_10 = arith.constant 0 : index
    %c0_11 = arith.constant 0 : index
    %c0_12 = arith.constant 0 : index
    %c0_13 = arith.constant 0 : index
    %22 = vector.load %arg6[%c0_10, %c0_11, %c0_12, %c0_13] : memref<1x8x16x128xf32, #tpu.memory_space<vmem>>, vector<1x8x16x128xf32>
    %23 = vector.shape_cast %22 : vector<1x8x16x128xf32> to vector<8x16x128xf32>
    %24 = vector.shape_cast %21 : vector<8x16x128xf32> to vector<1x8x16x128xf32>
    tpu.vector_store %arg6[%c0_10, %c0_11, %c0_12, %c0_13], %24 {strides = array<i32>} : memref<1x8x16x128xf32, #tpu.memory_space<vmem>>, vector<1x8x16x128xf32>,
    return
  }
  func.func @transform_1(%arg0: i32, %arg1: i32, %arg2: i32) -> (i32, i32) {
    %c0_i32 = arith.constant 0 : i32
    %c0_i32_0 = arith.constant 0 : i32
    return %c0_i32, %arg2 : i32, i32
  }
  func.func @transform_2(%arg0: i32, %arg1: i32, %arg2: i32) -> (i32, i32) {
    %c0_i32 = arith.constant 0 : i32
    %c0_i32_0 = arith.constant 0 : i32
    return %c0_i32, %arg2 : i32, i32
  }
  func.func @transform_3(%arg0: i32, %arg1: i32, %arg2: i32) -> (i32, i32, i32, i32) {
    %c0_i32 = arith.constant 0 : i32
    %c0_i32_0 = arith.constant 0 : i32
    return %arg0, %arg1, %c0_i32, %arg2 : i32, i32, i32, i32
  }
}

</mosaic_0001>

<bundles_post_ra>
// kernel: tpu_custom_call.1
= control target key start
LH: loop header
LB: loop body
LE: loop exit
PB: predicated region body
PF: predicated region fallthrough
CT: control target
= control target key end

     0   :  { %8 = vsyncpa [#allocation6], 0  ;;  %s3575_s0 = inlined_call_operand.vmem [shape: f32[2,18,18,128], index: 0, kind: input, shape index: {}]   ;;  %s3576_s1 = inlined_call_operand.vmem [shape: f32[1152,128], index: 1, kind: input, shape index: {}]   ;;  %s3577_s2 = inlined_call_operand.vmem [shape: f32[1,128], index: 2, kind: input, shape index: {}]   ;;  %s3578_s3 = inlined_call_operand.hbm [shape: f32[2,16,16,128], index: 3, kind: output, shape index: {}]  }
   0x1   :  { %10 = vsyncpa [#allocation6 + $0x1], 0  ;;  %s2348_s12 = smov 0   ;;  %s2350_s13 = smov 0  }
   0x2   :  { %s2352_s14 = smov 0   ;;  %s2354_s15 = smov 0  }
   0x3   :  { %s2356_s16 = smov 0   ;;  %s2358_s17 = smov 0  }
   0x4   :  { %s2360_s18 = smov 0   ;;  %s2362_s19 = smov 0  }
   0x5 LB: > { %s2032_s20 = sadd.s32 4294967295, %s2324_s19   ;;  %s2033_s21 = sadd.s32 4294967294, %s2324_s19   ;;  %s2324_s19 = sphi %s2362_s19, %s16_s19   ;;  %s2320_s18 = sphi %s2360_s18, %s3587_s18   ;;  %s2316_s17 = sphi %s2358_s17, %s3586_s17   ;;  %s2312_s16 = sphi %s2356_s16, %s3585_s16   ;;  %s2308_s15 = sphi %s2354_s15, %s3584_s15   ;;  %s2304_s14 = sphi %s2352_s14, %s3583_s14   ;;  %s2300_s13 = sphi %s2350_s13, %s3582_s13   ;;  %s2296_s12 = sphi %s2348_s12, %s3581_s12  }
   0x6   : > { %s31_s22 = sadd.s32 1, %s2316_s17  ;;  %s35_s23 = sadd.s32 1, %s2320_s18 }
   0x7   : > { %p33_p0 = scmp.ge.s32.totalorder %s31_s22, 2  ;;  %p108_p1 = scmp.ne.s32.totalorder %s2304_s14, %s2300_s13 }
   0x8   : > { %p109_p2 = scmp.eq.s32.totalorder %s2032_s20, 3  ;;  %p114_p5 = scmp.ne.s32.totalorder %s2300_s13, %s2296_s12 }
   0x9   : > { %s3589_s22 = smov (%p33_p0, %s31_s22), 0  ;;  %s3591_s23 = smov (!%p33_p0, %s35_s23), %s2320_s18 }
   0xa   : > { %s92_s24 = ssub.s32 %s2316_s17, %s3589_s22  ;;  %p2399_p3 = por %p109_p2, %p108_p1 }
   0xb   : > { %p37_p4 = scmp.ge.s32.totalorder %s3591_s23, 2  ;;  %p115_p6 = scmp.eq.s32.totalorder %s2033_s21, 3 }
   0xc   : > { %p2037_p7 = scmp.ge.s32.totalorder %s2324_s19, 1  ;;  %p146_p9 = scmp.lt.s32.totalorder %s2324_s19, 5 }
   0xd   : > { %s3593_s23 = smov (%p37_p4, %s3591_s23), 0  ;;  %p2408_p8 = por %p115_p6, %p114_p5 }
   0xe   : > { %s91_s27 = ssub.s32 %s2320_s18, %s3593_s23  ;;  %s98_s28 = sadd.s32 1, %s2304_s14 }
   0xf   : > { %s93_s29 = sor.u32 %s92_s24, %s91_s27  ;;  %p147_p10 = pnand %p2037_p7, %p146_p9 }
  0x10   : > { %p96_p11 = scmp.eq.s32.totalorder %s93_s29, 0  ;;  %s167_s4 = sand.u32 (!%p147_p10), 1, %s2300_s13  }
  0x11   : > { %150 = sbr.rel (%p147_p10) target bundleno = 866 (0x362), region = 28  ;;  %p178_p12 = scmp.lt.s32.totalorder (!%p147_p10), %s2308_s15, 0 }
  0x12   : > { %s2417_s30 = scalar_select %p96_p11, %s2304_s14, %s98_s28  }
  0x13   : > { %s2038_s5 = sshll.u32 (!%p147_p10), %s167_s4, 7  ;;  %s179_s6 = ssub.s32 (!%p147_p10), 0, %s2308_s15 }
  0x14   : > { %s2039_s7 = smin.u32 (!%p147_p10), %s2308_s15, %s179_s6  ;;  %s2427_s11 = scalar_lea.vmem (!%p147_p10), [#allocation5], %s2038_s5 }
  0x15   : > { %s181_s8 = sand.u32 (!%p147_p10), 1, %s2039_s7   ;;  %p2042_p0 = scmp.ne.s32.totalorder (!%p147_p10), %s2308_s15, 0 }
  0x16   : > { %s182_s9 = ssub.s32 0, %s181_s8  ;;  %s199_s20 = smul.u32 (!%p2042_p0), 432, %s2312_s16 }
  0x17   : > { %s3595_s9 = smov (!%p178_p12, %s182_s9), %s181_s8  ;;  %197 = sbr.rel (%p2042_p0) target bundleno = 60 (0x3c), region = 36 }
  0x18   : > { %p2041_p13 = scmp.lt.s32.totalorder %s3595_s9, 0  ;;  %s188_s10 = sadd.s32 2, %s3595_s9 }
  0x19   : > { %s2434_s27 = scalar_lea.vmem (!%p2042_p0), %s3575_s0, %s199_s20 }
  0x1a   : > { %s3597_s10 = smov (!%p2041_p13, %s188_s10), %s3595_s9 }
  0x1c   : > { %v214_v0 = vld [vmem:[%s2434_s27] sm:$0xff]  ;;  %v216_v1 = vld [vmem:[%s2434_s27 + $0x8] sm:$0xff]  ;;  %v218_v2 = vld [vmem:[%s2434_s27 + $0x18] sm:$0xff] }
  0x1d   : > { %215 = vst [vmem:[#allocation2] sm:$0xff] %v214_v0  ;;  %v220_v3 = vld [vmem:[%s2434_s27 + $0x20] sm:$0xff]  ;;  %v222_v4 = vld [vmem:[%s2434_s27 + $0x30] sm:$0xff]  ;;  %v224_v5 = vld [vmem:[%s2434_s27 + $0x38] sm:$0xff] }
  0x1e   : > { %217 = vst [vmem:[#allocation2 + $0x8] sm:$0xff] %v216_v1  ;;  %v226_v6 = vld [vmem:[%s2434_s27 + $0x48] sm:$0xff]  ;;  %v228_v7 = vld [vmem:[%s2434_s27 + $0x50] sm:$0xff]  ;;  %v230_v8 = vld [vmem:[%s2434_s27 + $0x60] sm:$0xff] }
  0x1f   : > { %219 = vst [vmem:[#allocation2 + $0x18] sm:$0xff] %v218_v2  ;;  %v232_v9 = vld [vmem:[%s2434_s27 + $0x68] sm:$0xff]  ;;  %v234_v10 = vld [vmem:[%s2434_s27 + $0x78] sm:$0xff]  ;;  %v236_v11 = vld [vmem:[%s2434_s27 + $0x80] sm:$0xff] }
  0x20   : > { %221 = vst [vmem:[#allocation2 + $0x20] sm:$0xff] %v220_v3  ;;  %v238_v12 = vld [vmem:[%s2434_s27 + $0x90] sm:$0xff]  ;;  %v240_v13 = vld [vmem:[%s2434_s27 + $0x98] sm:$0xff]  ;;  %v242_v14 = vld [vmem:[%s2434_s27 + $0xa8] sm:$0xff] }
  0x21   : > { %223 = vst [vmem:[#allocation2 + $0x30] sm:$0xff] %v222_v4  ;;  %v244_v15 = vld [vmem:[%s2434_s27 + $0xb0] sm:$0xff]  ;;  %v246_v16 = vld [vmem:[%s2434_s27 + $0xc0] sm:$0xff]  ;;  %v248_v17 = vld [vmem:[%s2434_s27 + $0xc8] sm:$0xff] }
  0x22   : > { %225 = vst [vmem:[#allocation2 + $0x38] sm:$0xff] %v224_v5  ;;  %v250_v18 = vld [vmem:[%s2434_s27 + $0xd8] sm:$0xff]  ;;  %v252_v19 = vld [vmem:[%s2434_s27 + $0xe0] sm:$0xff]  ;;  %v2043_v20 = vld [vmem:[%s2434_s27 + $0x10] sm:$0x3] }
  0x23   : > { %227 = vst [vmem:[#allocation2 + $0x48] sm:$0xff] %v226_v6  ;;  %v2044_v21 = vld [vmem:[%s2434_s27 + $0x28] sm:$0x3]  ;;  %v2045_v22 = vld [vmem:[%s2434_s27 + $0x40] sm:$0x3] }
  0x24   : > { %229 = vst [vmem:[#allocation2 + $0x50] sm:$0xff] %v228_v7  ;;  %v2046_v23 = vld [vmem:[%s2434_s27 + $0x58] sm:$0x3]  ;;  %v2047_v24 = vld [vmem:[%s2434_s27 + $0x70] sm:$0x3] }
  0x25   : > { %231 = vst [vmem:[#allocation2 + $0x60] sm:$0xff] %v230_v8  ;;  %v2048_v25 = vld [vmem:[%s2434_s27 + $0x88] sm:$0x3]  ;;  %v2049_v26 = vld [vmem:[%s2434_s27 + $0xa0] sm:$0x3] }
  0x26   : > { %233 = vst [vmem:[#allocation2 + $0x68] sm:$0xff] %v232_v9  ;;  %v2050_v27 = vld [vmem:[%s2434_s27 + $0xb8] sm:$0x3]  ;;  %v2051_v28 = vld [vmem:[%s2434_s27 + $0xd0] sm:$0x3] }
  0x27   : > { %235 = vst [vmem:[#allocation2 + $0x78] sm:$0xff] %v234_v10  ;;  %v2052_v29 = vld [vmem:[%s2434_s27 + $0xe8] sm:$0x3] }
  0x28   : > { %237 = vst [vmem:[#allocation2 + $0x80] sm:$0xff] %v236_v11 }
  0x29   : > { %239 = vst [vmem:[#allocation2 + $0x90] sm:$0xff] %v238_v12 }
  0x2a   : > { %241 = vst [vmem:[#allocation2 + $0x98] sm:$0xff] %v240_v13 }
  0x2b   : > { %243 = vst [vmem:[#allocation2 + $0xa8] sm:$0xff] %v242_v14 }
  0x2c   : > { %245 = vst [vmem:[#allocation2 + $0xb0] sm:$0xff] %v244_v15 }
  0x2d   : > { %247 = vst [vmem:[#allocation2 + $0xc0] sm:$0xff] %v246_v16 }
  0x2e   : > { %249 = vst [vmem:[#allocation2 + $0xc8] sm:$0xff] %v248_v17 }
  0x2f   : > { %251 = vst [vmem:[#allocation2 + $0xd8] sm:$0xff] %v250_v18 }
  0x30   : > { %253 = vst [vmem:[#allocation2 + $0xe0] sm:$0xff] %v252_v19 }
  0x31   : > { %265 = vst [vmem:[#allocation2 + $0x10] sm:$0x3] %v2043_v20 }
  0x32   : > { %267 = vst [vmem:[#allocation2 + $0x28] sm:$0x3] %v2044_v21 }
  0x33   : > { %269 = vst [vmem:[#allocation2 + $0x40] sm:$0x3] %v2045_v22 }
  0x34   : > { %271 = vst [vmem:[#allocation2 + $0x58] sm:$0x3] %v2046_v23 }
  0x35   : > { %273 = vst [vmem:[#allocation2 + $0x70] sm:$0x3] %v2047_v24 }
  0x36   : > { %275 = vst [vmem:[#allocation2 + $0x88] sm:$0x3] %v2048_v25 }
  0x37   : > { %277 = vst [vmem:[#allocation2 + $0xa0] sm:$0x3] %v2049_v26 }
  0x38   : > { %279 = vst [vmem:[#allocation2 + $0xb8] sm:$0x3] %v2050_v27 }
  0x39   : > { %281 = vst [vmem:[#allocation2 + $0xd0] sm:$0x3] %v2051_v28 }
  0x3a   : > { %283 = vst [vmem:[#allocation2 + $0xe8] sm:$0x3] %v2052_v29 }
  0x3b   : > { %287 = vsyncadd [#allocation4], 2880 }
  0x3c PF: > { %s288_s28 = sadd.s32 1, %s2308_s15 }
  0x3d   : > { %p2053_p1 = scmp.ge.s32.totalorder %s288_s28, 2 }
  0x3e   : > { %s293_s29 = ssub.s32 (!%p2053_p1), 1, %s3597_s10  ;;  %s1947_s5 = smul.u32 (!%p2053_p1), 192, %s2308_s15 }
  0x3f   : > { %292 = sbr.rel (%p2053_p1) target bundleno = 100 (0x64), region = 62  ;;  %s301_s27 = scalar_lea.sflag (!%p2053_p1), [#allocation4], %s293_s29 }
  0x40   : > { %s1948_s6 = smul.u32 (!%p2053_p1), 432, %s2312_s16 }
  0x41   : > { %s299_s7 = smul.u32 (!%p2053_p1), 240, %s293_s29 }
  0x42   : > { %s1949_s8 = sadd.s32 (!%p2053_p1), %s1948_s6, %s1947_s5 }
  0x43   : > { %s2475_s21 = scalar_lea.vmem (!%p2053_p1), %s3575_s0, %s1949_s8  ;;  %s2480_s24 = scalar_lea.vmem (!%p2053_p1), [#allocation2], %s299_s7 }
  0x44   : > { %v2054_v30 = vld [vmem:[%s2475_s21 + $0xc0] sm:$0xff]  ;;  %v2055_v31 = vld [vmem:[%s2475_s21 + $0xc8] sm:$0xff]  ;;  %v2056_v32 = vld [vmem:[%s2475_s21 + $0xd8] sm:$0xff] }
  0x45   : > { %315 = vst [vmem:[%s2480_s24] sm:$0xff] %v2054_v30  ;;  %v2057_v33 = vld [vmem:[%s2475_s21 + $0xe0] sm:$0xff]  ;;  %v2058_v34 = vld [vmem:[%s2475_s21 + $0xf0] sm:$0xff]  ;;  %v2059_v35 = vld [vmem:[%s2475_s21 + $0xf8] sm:$0xff] }
  0x46   : > { %317 = vst [vmem:[%s2480_s24 + $0x8] sm:$0xff] %v2055_v31  ;;  %v2060_v36 = vld [vmem:[%s2475_s21 + $0x108] sm:$0xff]  ;;  %v2061_v37 = vld [vmem:[%s2475_s21 + $0x110] sm:$0xff]  ;;  %v2062_v38 = vld [vmem:[%s2475_s21 + $0x120] sm:$0xff] }
  0x47   : > { %319 = vst [vmem:[%s2480_s24 + $0x18] sm:$0xff] %v2056_v32  ;;  %v2063_v39 = vld [vmem:[%s2475_s21 + $0x128] sm:$0xff]  ;;  %v2064_v40 = vld [vmem:[%s2475_s21 + $0x138] sm:$0xff]  ;;  %v2065_v41 = vld [vmem:[%s2475_s21 + $0x140] sm:$0xff] }
  0x48   : > { %321 = vst [vmem:[%s2480_s24 + $0x20] sm:$0xff] %v2057_v33  ;;  %v2066_v42 = vld [vmem:[%s2475_s21 + $0x150] sm:$0xff]  ;;  %v2067_v43 = vld [vmem:[%s2475_s21 + $0x158] sm:$0xff]  ;;  %v2068_v44 = vld [vmem:[%s2475_s21 + $0x168] sm:$0xff] }
  0x49   : > { %323 = vst [vmem:[%s2480_s24 + $0x30] sm:$0xff] %v2058_v34  ;;  %v2069_v45 = vld [vmem:[%s2475_s21 + $0x170] sm:$0xff]  ;;  %v2070_v46 = vld [vmem:[%s2475_s21 + $0x180] sm:$0xff]  ;;  %v2071_v47 = vld [vmem:[%s2475_s21 + $0x188] sm:$0xff] }
  0x4a   : > { %325 = vst [vmem:[%s2480_s24 + $0x38] sm:$0xff] %v2059_v35  ;;  %v2072_v48 = vld [vmem:[%s2475_s21 + $0x198] sm:$0xff]  ;;  %v2073_v49 = vld [vmem:[%s2475_s21 + $0x1a0] sm:$0xff]  ;;  %v2074_v50 = vld [vmem:[%s2475_s21 + $0xd0] sm:$0x3] }
  0x4b   : > { %327 = vst [vmem:[%s2480_s24 + $0x48] sm:$0xff] %v2060_v36  ;;  %v2076_v51 = vld [vmem:[%s2475_s21 + $0xe8] sm:$0x3]  ;;  %v2078_v52 = vld [vmem:[%s2475_s21 + $0x100] sm:$0x3] }
  0x4c   : > { %329 = vst [vmem:[%s2480_s24 + $0x50] sm:$0xff] %v2061_v37  ;;  %v2080_v53 = vld [vmem:[%s2475_s21 + $0x118] sm:$0x3]  ;;  %v2082_v54 = vld [vmem:[%s2475_s21 + $0x130] sm:$0x3] }
  0x4d   : > { %331 = vst [vmem:[%s2480_s24 + $0x60] sm:$0xff] %v2062_v38  ;;  %v2084_v55 = vld [vmem:[%s2475_s21 + $0x148] sm:$0x3]  ;;  %v2086_v56 = vld [vmem:[%s2475_s21 + $0x160] sm:$0x3] }
  0x4e   : > { %333 = vst [vmem:[%s2480_s24 + $0x68] sm:$0xff] %v2063_v39  ;;  %v2088_v57 = vld [vmem:[%s2475_s21 + $0x178] sm:$0x3]  ;;  %v2090_v58 = vld [vmem:[%s2475_s21 + $0x190] sm:$0x3] }
  0x4f   : > { %335 = vst [vmem:[%s2480_s24 + $0x78] sm:$0xff] %v2064_v40  ;;  %v2092_v59 = vld [vmem:[%s2475_s21 + $0x1a8] sm:$0x3] }
  0x50   : > { %337 = vst [vmem:[%s2480_s24 + $0x80] sm:$0xff] %v2065_v41 }
  0x51   : > { %339 = vst [vmem:[%s2480_s24 + $0x90] sm:$0xff] %v2066_v42 }
  0x52   : > { %341 = vst [vmem:[%s2480_s24 + $0x98] sm:$0xff] %v2067_v43 }
  0x53   : > { %343 = vst [vmem:[%s2480_s24 + $0xa8] sm:$0xff] %v2068_v44 }
  0x54   : > { %345 = vst [vmem:[%s2480_s24 + $0xb0] sm:$0xff] %v2069_v45 }
  0x55   : > { %347 = vst [vmem:[%s2480_s24 + $0xc0] sm:$0xff] %v2070_v46 }
  0x56   : > { %349 = vst [vmem:[%s2480_s24 + $0xc8] sm:$0xff] %v2071_v47 }
  0x57   : > { %351 = vst [vmem:[%s2480_s24 + $0xd8] sm:$0xff] %v2072_v48 }
  0x58   : > { %353 = vst [vmem:[%s2480_s24 + $0xe0] sm:$0xff] %v2073_v49 }
  0x59   : > { %2075 = vst [vmem:[%s2480_s24 + $0x10] sm:$0x3] %v2074_v50 }
  0x5a   : > { %2077 = vst [vmem:[%s2480_s24 + $0x28] sm:$0x3] %v2076_v51 }
  0x5b   : > { %2079 = vst [vmem:[%s2480_s24 + $0x40] sm:$0x3] %v2078_v52 }
  0x5c   : > { %2081 = vst [vmem:[%s2480_s24 + $0x58] sm:$0x3] %v2080_v53 }
  0x5d   : > { %2083 = vst [vmem:[%s2480_s24 + $0x70] sm:$0x3] %v2082_v54 }
  0x5e   : > { %2085 = vst [vmem:[%s2480_s24 + $0x88] sm:$0x3] %v2084_v55 }
  0x5f   : > { %2087 = vst [vmem:[%s2480_s24 + $0xa0] sm:$0x3] %v2086_v56 }
  0x60   : > { %2089 = vst [vmem:[%s2480_s24 + $0xb8] sm:$0x3] %v2088_v57 }
  0x61   : > { %2091 = vst [vmem:[%s2480_s24 + $0xd0] sm:$0x3] %v2090_v58 }
  0x62   : > { %2093 = vst [vmem:[%s2480_s24 + $0xe8] sm:$0x3] %v2092_v59 }
  0x63   : > { %387 = vsyncadd %s301_s27, 2880 }
  0x64 PF: > { %s389_s28 = scalar_lea.sflag [#allocation4], %s3597_s10 }
  0x65   : > { %2288 = dma.done.wait %s389_s28, 2880 }
  0x66   : > { %2289 = vsyncadd %s389_s28, 4294964416  ;;  %p2094_p2 = scmp.ne.s32.totalorder %s3597_s10, 0 }
  0x68   : > { %397 = sbr.rel (%p2094_p2) target bundleno = 254 (0xfe), region = 88 }
  0x6d   : > { %v398_v60 = vld [vmem:[#allocation2] sm:$0xff]  ;;  %v399_v61 = vld [vmem:[#allocation2 + $0x8] sm:$0xff]  ;;  %v2543_v62 = vld [vmem:[#allocation2 + $0x18] sm:$0xff] }
  0x6e   : > { %414 = vst [vmem:[#allocation3 + $0x1d8] sm:$0xff] %v398_v60  ;;  %v2545_v63 = vld [vmem:[#allocation2 + $0x20] sm:$0xff]  ;;  %v2547_v0 = vld [vmem:[#allocation2 + $0x30] sm:$0xff]  ;;  %v2550_v1 = vld [vmem:[#allocation2 + $0x38] sm:$0xff] }
  0x6f   : > { %415 = vst [vmem:[#allocation3 + $0x1e8] sm:$0xff] %v399_v61  ;;  %v2553_v2 = vld [vmem:[#allocation2 + $0x48] sm:$0xff]  ;;  %v2556_v3 = vld [vmem:[#allocation2 + $0x50] sm:$0xff]  ;;  %v2559_v4 = vld [vmem:[#allocation2 + $0x60] sm:$0xff] }
  0x70   : > { %416 = vst [vmem:[#allocation3 + $0x90] sm:$0xff] %v2543_v62  ;;  %v2562_v5 = vld [vmem:[#allocation2 + $0x68] sm:$0xff]  ;;  %v2565_v6 = vld [vmem:[#allocation2 + $0x78] sm:$0xff]  ;;  %v2568_v7 = vld [vmem:[#allocation2 + $0x80] sm:$0xff] }
  0x71   : > { %417 = vst [vmem:[#allocation3 + $0x2c8] sm:$0xff] %v2545_v63  ;;  %v2571_v8 = vld [vmem:[#allocation2 + $0x90] sm:$0xff]  ;;  %v2574_v9 = vld [vmem:[#allocation2 + $0x98] sm:$0xff]  ;;  %v2577_v10 = vld [vmem:[#allocation2 + $0xa8] sm:$0xff] }
  0x72   : > { %418 = vst [vmem:[#allocation3 + $0x150] sm:$0xff] %v2547_v0  ;;  %v2580_v11 = vld [vmem:[#allocation2 + $0xb0] sm:$0xff]  ;;  %v430_v12 = vld [vmem:[#allocation2 + $0x1] sm:$0xff]  ;;  %v2585_v14 = vld [vmem:[#allocation2 + $0x19] sm:$0xff] }
  0x73   : > { %419 = vst [vmem:[#allocation3 + $0x238] sm:$0xff] %v2550_v1  ;;  %v431_v13 = vld [vmem:[#allocation2 + $0x9] sm:$0xff]  ;;  %v2587_v15 = vld [vmem:[#allocation2 + $0x21] sm:$0xff]  ;;  %v2589_v16 = vld [vmem:[#allocation2 + $0x31] sm:$0xff] }
  0x74   : > { %420 = vst [vmem:[#allocation3 + $0x420] sm:$0xff] %v2553_v2  ;;  %v2592_v17 = vld [vmem:[#allocation2 + $0x39] sm:$0xff]  ;;  %v2595_v18 = vld [vmem:[#allocation2 + $0x49] sm:$0xff]  ;;  %v2598_v19 = vld [vmem:[#allocation2 + $0x51] sm:$0xff] }
  0x75   : > { %421 = vst [vmem:[#allocation3 + $0x10] sm:$0xff] %v2556_v3  ;;  %v2601_v20 = vld [vmem:[#allocation2 + $0x61] sm:$0xff]  ;;  %v2604_v21 = vld [vmem:[#allocation2 + $0x69] sm:$0xff]  ;;  %v2607_v22 = vld [vmem:[#allocation2 + $0x79] sm:$0xff] }
  0x76   : > { %422 = vst [vmem:[#allocation3 + $0x30] sm:$0xff] %v2559_v4  ;;  %v2610_v23 = vld [vmem:[#allocation2 + $0x81] sm:$0xff]  ;;  %v2613_v24 = vld [vmem:[#allocation2 + $0x91] sm:$0xff]  ;;  %v2616_v25 = vld [vmem:[#allocation2 + $0x99] sm:$0xff] }
  0x77   : > { %423 = vst [vmem:[#allocation3 + $0x418] sm:$0xff] %v2562_v5  ;;  %v2619_v26 = vld [vmem:[#allocation2 + $0xa9] sm:$0xff]  ;;  %v2622_v27 = vld [vmem:[#allocation2 + $0xb1] sm:$0xff]  ;;  %v2627_v30 = vld [vmem:[#allocation2 + $0x1a] sm:$0xff] }
  0x78   : > { %424 = vst [vmem:[#allocation3 + $0xb8] sm:$0xff] %v2565_v6  ;;  %v462_v28 = vld [vmem:[#allocation2 + $0x2] sm:$0xff]  ;;  %v463_v29 = vld [vmem:[#allocation2 + $0xa] sm:$0xff]  ;;  %v2631_v32 = vld [vmem:[#allocation2 + $0x32] sm:$0xff] }
  0x79   : > { %425 = vst [vmem:[#allocation3 + $0x38] sm:$0xff] %v2568_v7  ;;  %v2629_v31 = vld [vmem:[#allocation2 + $0x22] sm:$0xff]  ;;  %v2634_v33 = vld [vmem:[#allocation2 + $0x3a] sm:$0xff]  ;;  %v2637_v34 = vld [vmem:[#allocation2 + $0x4a] sm:$0xff] }
  0x7a   : > { %426 = vst [vmem:[#allocation3 + $0x288] sm:$0xff] %v2571_v8  ;;  %v2640_v35 = vld [vmem:[#allocation2 + $0x52] sm:$0xff]  ;;  %v2643_v36 = vld [vmem:[#allocation2 + $0x62] sm:$0xff]  ;;  %v2646_v37 = vld [vmem:[#allocation2 + $0x6a] sm:$0xff] }
  0x7b   : > { %427 = vst [vmem:[#allocation3 + $0x248] sm:$0xff] %v2574_v9  ;;  %v2649_v38 = vld [vmem:[#allocation2 + $0x7a] sm:$0xff]  ;;  %v2652_v39 = vld [vmem:[#allocation2 + $0x82] sm:$0xff]  ;;  %v2655_v40 = vld [vmem:[#allocation2 + $0x92] sm:$0xff] }
  0x7c   : > { %428 = vst [vmem:[#allocation3 + $0x1b0] sm:$0xff] %v2577_v10  ;;  %v2658_v41 = vld [vmem:[#allocation2 + $0x9a] sm:$0xff]  ;;  %v2661_v42 = vld [vmem:[#allocation2 + $0xaa] sm:$0xff]  ;;  %v2664_v43 = vld [vmem:[#allocation2 + $0xb2] sm:$0xff] }
  0x7d   : > { %429 = vst [vmem:[#allocation3 + $0x298] sm:$0xff] %v2580_v11  ;;  %v509_v44 = vld [vmem:[#allocation2 + $0xc0] sm:$0xff]  ;;  %v510_v45 = vld [vmem:[#allocation2 + $0xc8] sm:$0xff]  ;;  %v606_v50 = vld [vmem:[#allocation2 + $0xd8] sm:$0xff] }
  0x7e   : > { %446 = vst [vmem:[#allocation3 + $0x68] sm:$0xff] %v430_v12  ;;  %v541_v46 = vld [vmem:[#allocation2 + $0xc1] sm:$0xff]  ;;  %v542_v47 = vld [vmem:[#allocation2 + $0xc9] sm:$0xff]  ;;  %v638_v52 = vld [vmem:[#allocation2 + $0xd9] sm:$0xff] }
  0x7f   : > { %447 = vst [vmem:[#allocation3 + $0x50] sm:$0xff] %v431_v13  ;;  %v573_v48 = vld [vmem:[#allocation2 + $0xc2] sm:$0xff]  ;;  %v574_v49 = vld [vmem:[#allocation2 + $0xca] sm:$0xff]  ;;  %v670_v54 = vld [vmem:[#allocation2 + $0xda] sm:$0xff] }
  0x80   : > { %448 = vst [vmem:[#allocation3 + $0x2b8] sm:$0xff] %v2585_v14  ;;  %v607_v51 = vld [vmem:[#allocation2 + $0xe0] sm:$0xff] }
  0x81   : > { %449 = vst [vmem:[#allocation3 + $0x368] sm:$0xff] %v2587_v15  ;;  %v639_v53 = vld [vmem:[#allocation2 + $0xe1] sm:$0xff] }
  0x82   : > { %450 = vst [vmem:[#allocation3 + $0x3d8] sm:$0xff] %v2589_v16  ;;  %v671_v55 = vld [vmem:[#allocation2 + $0xe2] sm:$0xff] }
  0x83   : > { %451 = vst [vmem:[#allocation3 + $0x398] sm:$0xff] %v2592_v17 }
  0x84   : > { %452 = vst [vmem:[#allocation3 + $0x180] sm:$0xff] %v2595_v18 }
  0x85   : > { %453 = vst [vmem:[#allocation3 + $0x310] sm:$0xff] %v2598_v19 }
  0x86   : > { %454 = vst [vmem:[#allocation3 + $0x160] sm:$0xff] %v2601_v20 }
  0x87   : > { %455 = vst [vmem:[#allocation3 + $0x110] sm:$0xff] %v2604_v21 }
  0x88   : > { %456 = vst [vmem:[#allocation3 + $0x300] sm:$0xff] %v2607_v22 }
  0x89   : > { %457 = vst [vmem:[#allocation3 + $0x290] sm:$0xff] %v2610_v23 }
  0x8a   : > { %458 = vst [vmem:[#allocation3 + $0x260] sm:$0xff] %v2613_v24 }
  0x8b   : > { %459 = vst [vmem:[#allocation3 + $0xc8] sm:$0xff] %v2616_v25 }
  0x8c   : > { %460 = vst [vmem:[#allocation3 + $0x358] sm:$0xff] %v2619_v26 }
  0x8d   : > { %461 = vst [vmem:[#allocation3 + $0x3a8] sm:$0xff] %v2622_v27 }
  0x8e   : > { %478 = vst [vmem:[#allocation3 + $0x430] sm:$0xff] %v462_v28 }
  0x8f   : > { %479 = vst [vmem:[#allocation3 + $0x100] sm:$0xff] %v463_v29 }
  0x90   : > { %480 = vst [vmem:[#allocation3 + $0x458] sm:$0xff] %v2627_v30 }
  0x91   : > { %481 = vst [vmem:[#allocation3 + $0x400] sm:$0xff] %v2629_v31 }
  0x92   : > { %482 = vst [vmem:[#allocation3 + $0xf0] sm:$0xff] %v2631_v32 }
  0x93   : > { %483 = vst [vmem:[#allocation3 + $0x1b8] sm:$0xff] %v2634_v33 }
  0x94   : > { %484 = vst [vmem:[#allocation3 + $0x120] sm:$0xff] %v2637_v34 }
  0x95   : > { %485 = vst [vmem:[#allocation3 + $0x3c0] sm:$0xff] %v2640_v35 }
  0x96   : > { %486 = vst [vmem:[#allocation3 + $0x450] sm:$0xff] %v2643_v36 }
  0x97   : > { %487 = vst [vmem:[#allocation3 + $0x360] sm:$0xff] %v2646_v37 }
  0x98   : > { %488 = vst [vmem:[#allocation3 + $0x2c0] sm:$0xff] %v2649_v38 }
  0x99   : > { %489 = vst [vmem:[#allocation3 + $0xd8] sm:$0xff] %v2652_v39 }
  0x9a   : > { %490 = vst [vmem:[#allocation3 + $0x128] sm:$0xff] %v2655_v40 }
  0x9b   : > { %491 = vst [vmem:[#allocation3 + $0x2e8] sm:$0xff] %v2658_v41 }
  0x9c   : > { %492 = vst [vmem:[#allocation3 + $0x338] sm:$0xff] %v2661_v42 }
  0x9d   : > { %493 = vst [vmem:[#allocation3 + $0x2d8] sm:$0xff] %v2664_v43 }
  0x9e   : > { %511 = vst [vmem:[#allocation3 + $0x88] sm:$0xff] %v2543_v62 }
  0x9f   : > { %512 = vst [vmem:[#allocation3 + $0x268] sm:$0xff] %v2545_v63 }
  0xa0   : > { %513 = vst [vmem:[#allocation3 + $0x470] sm:$0xff] %v2547_v0 }
  0xa1   : > { %514 = vst [vmem:[#allocation3 + $0x428] sm:$0xff] %v2550_v1 }
  0xa2   : > { %515 = vst [vmem:[#allocation3 + $0x228] sm:$0xff] %v2553_v2 }
  0xa3   : > { %516 = vst [vmem:[#allocation3 + $0x2a8] sm:$0xff] %v2556_v3 }
  0xa4   : > { %517 = vst [vmem:[#allocation3 + $0x1e0] sm:$0xff] %v2559_v4 }
  0xa5   : > { %518 = vst [vmem:[#allocation3 + $0x140] sm:$0xff] %v2562_v5 }
  0xa6   : > { %519 = vst [vmem:[#allocation3 + $0x210] sm:$0xff] %v2565_v6 }
  0xa7   : > { %520 = vst [vmem:[#allocation3 + $0xc0] sm:$0xff] %v2568_v7 }
  0xa8   : > { %521 = vst [vmem:[#allocation3 + $0x28] sm:$0xff] %v2571_v8 }
  0xa9   : > { %522 = vst [vmem:[#allocation3 + $0x70] sm:$0xff] %v2574_v9 }
  0xaa   : > { %523 = vst [vmem:[#allocation3 + $0x3d0] sm:$0xff] %v2577_v10 }
  0xab   : > { %524 = vst [vmem:[#allocation3 + $0x130] sm:$0xff] %v2580_v11 }
  0xac   : > { %525 = vst [vmem:[#allocation3 + $0x2b0] sm:$0xff] %v509_v44 }
  0xad   : > { %526 = vst [vmem:[#allocation3 + $0x278] sm:$0xff] %v510_v45 }
  0xae   : > { %543 = vst [vmem:[#allocation3 + $0x118] sm:$0xff] %v2585_v14 }
  0xaf   : > { %544 = vst [vmem:[#allocation3 + $0x3f0] sm:$0xff] %v2587_v15 }
  0xb0   : > { %545 = vst [vmem:[#allocation3 + $0x410] sm:$0xff] %v2589_v16 }
  0xb1   : > { %546 = vst [vmem:[#allocation3 + $0x20] sm:$0xff] %v2592_v17 }
  0xb2   : > { %547 = vst [vmem:[#allocation3 + $0x138] sm:$0xff] %v2595_v18 }
  0xb3   : > { %548 = vst [vmem:[#allocation3 + $0x250] sm:$0xff] %v2598_v19 }
  0xb4   : > { %549 = vst [vmem:[#allocation3 + $0x158] sm:$0xff] %v2601_v20 }
  0xb5   : > { %550 = vst [vmem:[#allocation3 + $0x440] sm:$0xff] %v2604_v21 }
  0xb6   : > { %551 = vst [vmem:[#allocation3 + $0x178] sm:$0xff] %v2607_v22 }
  0xb7   : > { %552 = vst [vmem:[#allocation3 + $0x370] sm:$0xff] %v2610_v23 }
  0xb8   : > { %553 = vst [vmem:[#allocation3 + $0x190] sm:$0xff] %v2613_v24 }
  0xb9   : > { %554 = vst [vmem:[#allocation3 + $0x1c0] sm:$0xff] %v2616_v25 }
  0xba   : > { %555 = vst [vmem:[#allocation3 + $0x108] sm:$0xff] %v2619_v26 }
  0xbb   : > { %556 = vst [vmem:[#allocation3 + $0x3c8] sm:$0xff] %v2622_v27 }
  0xbc   : > { %557 = vst [vmem:[#allocation3 + $0x188] sm:$0xff] %v541_v46 }
  0xbd   : > { %558 = vst [vmem:[#allocation3 + $0xd0] sm:$0xff] %v542_v47 }
  0xbe   : > { %575 = vst [vmem:[#allocation3 + $0xb0] sm:$0xff] %v2627_v30 }
  0xbf   : > { %576 = vst [vmem:[#allocation3 + $0x258] sm:$0xff] %v2629_v31 }
  0xc0   : > { %577 = vst [vmem:[#allocation3 + $0x348] sm:$0xff] %v2631_v32 }
  0xc1   : > { %578 = vst [vmem:[#allocation3 + $0x48] sm:$0xff] %v2634_v33 }
  0xc2   : > { %579 = vst [vmem:[#allocation3 + $0x40] sm:$0xff] %v2637_v34 }
  0xc3   : > { %580 = vst [vmem:[#allocation3 + $0x1c8] sm:$0xff] %v2640_v35 }
  0xc4   : > { %581 = vst [vmem:[#allocation3 + $0x198] sm:$0xff] %v2643_v36 }
  0xc5   : > { %582 = vst [vmem:[#allocation3 + $0x1d0] sm:$0xff] %v2646_v37 }
  0xc6   : > { %583 = vst [vmem:[#allocation3 + $0x200] sm:$0xff] %v2649_v38 }
  0xc7   : > { %584 = vst [vmem:[#allocation3 + $0x3e8] sm:$0xff] %v2652_v39 }
  0xc8   : > { %585 = vst [vmem:[#allocation3 + $0x2f8] sm:$0xff] %v2655_v40 }
  0xc9   : > { %586 = vst [vmem:[#allocation3 + $0x438] sm:$0xff] %v2658_v41 }
  0xca   : > { %587 = vst [vmem:[#allocation3 + $0x460] sm:$0xff] %v2661_v42 }
  0xcb   : > { %588 = vst [vmem:[#allocation3 + $0xf8] sm:$0xff] %v2664_v43 }
  0xcc   : > { %589 = vst [vmem:[#allocation3 + $0x408] sm:$0xff] %v573_v48 }
  0xcd   : > { %590 = vst [vmem:[#allocation3 + $0x448] sm:$0xff] %v574_v49 }
  0xce   : > { %608 = vst [vmem:[#allocation3 + $0xa0] sm:$0xff] %v2547_v0 }
  0xcf   : > { %609 = vst [vmem:[#allocation3 + $0x3a0] sm:$0xff] %v2550_v1 }
  0xd0   : > { %610 = vst [vmem:[#allocation3 + $0x148] sm:$0xff] %v2553_v2 }
  0xd1   : > { %611 = vst [vmem:[#allocation3 + $0x350] sm:$0xff] %v2556_v3 }
  0xd2   : > { %612 = vst [vmem:[#allocation3 + $0x170] sm:$0xff] %v2559_v4 }
  0xd3   : > { %613 = vst [vmem:[#allocation3 + $0x330] sm:$0xff] %v2562_v5 }
  0xd4   : > { %614 = vst [vmem:[#allocation3 + $0xe8] sm:$0xff] %v2565_v6 }
  0xd5   : > { %615 = vst [vmem:[#allocation3] sm:$0xff] %v2568_v7 }
  0xd6   : > { %616 = vst [vmem:[#allocation3 + $0x478] sm:$0xff] %v2571_v8 }
  0xd7   : > { %617 = vst [vmem:[#allocation3 + $0x208] sm:$0xff] %v2574_v9 }
  0xd8   : > { %618 = vst [vmem:[#allocation3 + $0x320] sm:$0xff] %v2577_v10 }
  0xd9   : > { %619 = vst [vmem:[#allocation3 + $0x340] sm:$0xff] %v2580_v11 }
  0xda   : > { %620 = vst [vmem:[#allocation3 + $0x380] sm:$0xff] %v509_v44 }
  0xdb   : > { %621 = vst [vmem:[#allocation3 + $0x230] sm:$0xff] %v510_v45 }
  0xdc   : > { %622 = vst [vmem:[#allocation3 + $0x18] sm:$0xff] %v606_v50 }
  0xdd   : > { %623 = vst [vmem:[#allocation3 + $0x168] sm:$0xff] %v607_v51 }
  0xde   : > { %640 = vst [vmem:[#allocation3 + $0x58] sm:$0xff] %v2589_v16 }
  0xdf   : > { %641 = vst [vmem:[#allocation3 + $0x468] sm:$0xff] %v2592_v17 }
  0xe0   : > { %642 = vst [vmem:[#allocation3 + $0x280] sm:$0xff] %v2595_v18 }
  0xe1   : > { %643 = vst [vmem:[#allocation3 + $0x328] sm:$0xff] %v2598_v19 }
  0xe2   : > { %644 = vst [vmem:[#allocation3 + $0x390] sm:$0xff] %v2601_v20 }
  0xe3   : > { %645 = vst [vmem:[#allocation3 + $0x2d0] sm:$0xff] %v2604_v21 }
  0xe4   : > { %646 = vst [vmem:[#allocation3 + $0x78] sm:$0xff] %v2607_v22 }
  0xe5   : > { %647 = vst [vmem:[#allocation3 + $0x270] sm:$0xff] %v2610_v23 }
  0xe6   : > { %648 = vst [vmem:[#allocation3 + $0x388] sm:$0xff] %v2613_v24 }
  0xe7   : > { %649 = vst [vmem:[#allocation3 + $0x3e0] sm:$0xff] %v2616_v25 }
  0xe8   : > { %650 = vst [vmem:[#allocation3 + $0x2f0] sm:$0xff] %v2619_v26 }
  0xe9   : > { %651 = vst [vmem:[#allocation3 + $0x2a0] sm:$0xff] %v2622_v27 }
  0xea   : > { %652 = vst [vmem:[#allocation3 + $0xa8] sm:$0xff] %v541_v46 }
  0xeb   : > { %653 = vst [vmem:[#allocation3 + $0x308] sm:$0xff] %v542_v47 }
  0xec   : > { %654 = vst [vmem:[#allocation3 + $0x3b0] sm:$0xff] %v638_v52 }
  0xed   : > { %655 = vst [vmem:[#allocation3 + $0x3f8] sm:$0xff] %v639_v53 }
  0xee   : > { %672 = vst [vmem:[#allocation3 + $0x3b8] sm:$0xff] %v2631_v32 }
  0xef   : > { %673 = vst [vmem:[#allocation3 + $0x98] sm:$0xff] %v2634_v33 }
  0xf0   : > { %674 = vst [vmem:[#allocation3 + $0x378] sm:$0xff] %v2637_v34 }
  0xf1   : > { %675 = vst [vmem:[#allocation3 + $0x1f8] sm:$0xff] %v2640_v35 }
  0xf2   : > { %676 = vst [vmem:[#allocation3 + $0x80] sm:$0xff] %v2643_v36 }
  0xf3   : > { %677 = vst [vmem:[#allocation3 + $0x1f0] sm:$0xff] %v2646_v37 }
  0xf4   : > { %678 = vst [vmem:[#allocation3 + $0x8] sm:$0xff] %v2649_v38 }
  0xf5   : > { %679 = vst [vmem:[#allocation3 + $0x1a8] sm:$0xff] %v2652_v39 }
  0xf6   : > { %680 = vst [vmem:[#allocation3 + $0x218] sm:$0xff] %v2655_v40 }
  0xf7   : > { %681 = vst [vmem:[#allocation3 + $0x220] sm:$0xff] %v2658_v41 }
  0xf8   : > { %682 = vst [vmem:[#allocation3 + $0x240] sm:$0xff] %v2661_v42 }
  0xf9   : > { %683 = vst [vmem:[#allocation3 + $0x2e0] sm:$0xff] %v2664_v43 }
  0xfa   : > { %684 = vst [vmem:[#allocation3 + $0x1a0] sm:$0xff] %v573_v48 }
  0xfb   : > { %685 = vst [vmem:[#allocation3 + $0xe0] sm:$0xff] %v574_v49 }
  0xfc   : > { %686 = vst [vmem:[#allocation3 + $0x318] sm:$0xff] %v670_v54 }
  0xfd   : > { %687 = vst [vmem:[#allocation3 + $0x60] sm:$0xff] %v671_v55 }
  0xfe PF: > { %p2095_p4 = scmp.ne.s32.totalorder %s3597_s10, 1 }
 0x100   : > { %691 = sbr.rel (%p2095_p4) target bundleno = 406 (0x196), region = 92 }
 0x105   : > { %v693_v56 = vld [vmem:[#allocation2 + $0xf0] sm:$0xff]  ;;  %v694_v57 = vld [vmem:[#allocation2 + $0xf8] sm:$0xff]  ;;  %v2748_v58 = vld [vmem:[#allocation2 + $0x108] sm:$0xff] }
 0x106   : > { %709 = vst [vmem:[#allocation3 + $0x1d8] sm:$0xff] %v693_v56  ;;  %v2750_v59 = vld [vmem:[#allocation2 + $0x110] sm:$0xff]  ;;  %v2752_v60 = vld [vmem:[#allocation2 + $0x120] sm:$0xff]  ;;  %v2755_v61 = vld [vmem:[#allocation2 + $0x128] sm:$0xff] }
 0x107   : > { %710 = vst [vmem:[#allocation3 + $0x1e8] sm:$0xff] %v694_v57  ;;  %v2758_v62 = vld [vmem:[#allocation2 + $0x138] sm:$0xff]  ;;  %v2761_v63 = vld [vmem:[#allocation2 + $0x140] sm:$0xff]  ;;  %v2764_v0 = vld [vmem:[#allocation2 + $0x150] sm:$0xff] }
 0x108   : > { %711 = vst [vmem:[#allocation3 + $0x90] sm:$0xff] %v2748_v58  ;;  %v2767_v1 = vld [vmem:[#allocation2 + $0x158] sm:$0xff]  ;;  %v2770_v2 = vld [vmem:[#allocation2 + $0x168] sm:$0xff]  ;;  %v2773_v3 = vld [vmem:[#allocation2 + $0x170] sm:$0xff] }
 0x109   : > { %712 = vst [vmem:[#allocation3 + $0x2c8] sm:$0xff] %v2750_v59  ;;  %v2776_v4 = vld [vmem:[#allocation2 + $0x180] sm:$0xff]  ;;  %v2779_v5 = vld [vmem:[#allocation2 + $0x188] sm:$0xff]  ;;  %v2782_v6 = vld [vmem:[#allocation2 + $0x198] sm:$0xff] }
 0x10a   : > { %713 = vst [vmem:[#allocation3 + $0x150] sm:$0xff] %v2752_v60  ;;  %v2785_v7 = vld [vmem:[#allocation2 + $0x1a0] sm:$0xff]  ;;  %v725_v8 = vld [vmem:[#allocation2 + $0xf1] sm:$0xff]  ;;  %v2790_v10 = vld [vmem:[#allocation2 + $0x109] sm:$0xff] }
 0x10b   : > { %714 = vst [vmem:[#allocation3 + $0x238] sm:$0xff] %v2755_v61  ;;  %v726_v9 = vld [vmem:[#allocation2 + $0xf9] sm:$0xff]  ;;  %v2792_v11 = vld [vmem:[#allocation2 + $0x111] sm:$0xff]  ;;  %v2794_v12 = vld [vmem:[#allocation2 + $0x121] sm:$0xff] }
 0x10c   : > { %715 = vst [vmem:[#allocation3 + $0x420] sm:$0xff] %v2758_v62  ;;  %v2797_v13 = vld [vmem:[#allocation2 + $0x129] sm:$0xff]  ;;  %v2800_v14 = vld [vmem:[#allocation2 + $0x139] sm:$0xff]  ;;  %v2803_v15 = vld [vmem:[#allocation2 + $0x141] sm:$0xff] }
 0x10d   : > { %716 = vst [vmem:[#allocation3 + $0x10] sm:$0xff] %v2761_v63  ;;  %v2806_v16 = vld [vmem:[#allocation2 + $0x151] sm:$0xff]  ;;  %v2809_v17 = vld [vmem:[#allocation2 + $0x159] sm:$0xff]  ;;  %v2812_v18 = vld [vmem:[#allocation2 + $0x169] sm:$0xff] }
 0x10e   : > { %717 = vst [vmem:[#allocation3 + $0x30] sm:$0xff] %v2764_v0  ;;  %v2815_v19 = vld [vmem:[#allocation2 + $0x171] sm:$0xff]  ;;  %v2818_v20 = vld [vmem:[#allocation2 + $0x181] sm:$0xff]  ;;  %v2821_v21 = vld [vmem:[#allocation2 + $0x189] sm:$0xff] }
 0x10f   : > { %718 = vst [vmem:[#allocation3 + $0x418] sm:$0xff] %v2767_v1  ;;  %v2824_v22 = vld [vmem:[#allocation2 + $0x199] sm:$0xff]  ;;  %v2827_v23 = vld [vmem:[#allocation2 + $0x1a1] sm:$0xff]  ;;  %v2832_v26 = vld [vmem:[#allocation2 + $0x10a] sm:$0xff] }
 0x110   : > { %719 = vst [vmem:[#allocation3 + $0xb8] sm:$0xff] %v2770_v2  ;;  %v757_v24 = vld [vmem:[#allocation2 + $0xf2] sm:$0xff]  ;;  %v758_v25 = vld [vmem:[#allocation2 + $0xfa] sm:$0xff]  ;;  %v2836_v28 = vld [vmem:[#allocation2 + $0x122] sm:$0xff] }
 0x111   : > { %720 = vst [vmem:[#allocation3 + $0x38] sm:$0xff] %v2773_v3  ;;  %v2834_v27 = vld [vmem:[#allocation2 + $0x112] sm:$0xff]  ;;  %v2839_v29 = vld [vmem:[#allocation2 + $0x12a] sm:$0xff]  ;;  %v2842_v30 = vld [vmem:[#allocation2 + $0x13a] sm:$0xff] }
 0x112   : > { %721 = vst [vmem:[#allocation3 + $0x288] sm:$0xff] %v2776_v4  ;;  %v2845_v31 = vld [vmem:[#allocation2 + $0x142] sm:$0xff]  ;;  %v2848_v32 = vld [vmem:[#allocation2 + $0x152] sm:$0xff]  ;;  %v2851_v33 = vld [vmem:[#allocation2 + $0x15a] sm:$0xff] }
 0x113   : > { %722 = vst [vmem:[#allocation3 + $0x248] sm:$0xff] %v2779_v5  ;;  %v2854_v34 = vld [vmem:[#allocation2 + $0x16a] sm:$0xff]  ;;  %v2857_v35 = vld [vmem:[#allocation2 + $0x172] sm:$0xff]  ;;  %v2860_v36 = vld [vmem:[#allocation2 + $0x182] sm:$0xff] }
 0x114   : > { %723 = vst [vmem:[#allocation3 + $0x1b0] sm:$0xff] %v2782_v6  ;;  %v2863_v37 = vld [vmem:[#allocation2 + $0x18a] sm:$0xff]  ;;  %v2866_v38 = vld [vmem:[#allocation2 + $0x19a] sm:$0xff]  ;;  %v2869_v39 = vld [vmem:[#allocation2 + $0x1a2] sm:$0xff] }
 0x115   : > { %724 = vst [vmem:[#allocation3 + $0x298] sm:$0xff] %v2785_v7  ;;  %v804_v40 = vld [vmem:[#allocation2 + $0x1b0] sm:$0xff]  ;;  %v805_v41 = vld [vmem:[#allocation2 + $0x1b8] sm:$0xff]  ;;  %v901_v46 = vld [vmem:[#allocation2 + $0x1c8] sm:$0xff] }
 0x116   : > { %741 = vst [vmem:[#allocation3 + $0x68] sm:$0xff] %v725_v8  ;;  %v836_v42 = vld [vmem:[#allocation2 + $0x1b1] sm:$0xff]  ;;  %v837_v43 = vld [vmem:[#allocation2 + $0x1b9] sm:$0xff]  ;;  %v933_v48 = vld [vmem:[#allocation2 + $0x1c9] sm:$0xff] }
 0x117   : > { %742 = vst [vmem:[#allocation3 + $0x50] sm:$0xff] %v726_v9  ;;  %v868_v44 = vld [vmem:[#allocation2 + $0x1b2] sm:$0xff]  ;;  %v869_v45 = vld [vmem:[#allocation2 + $0x1ba] sm:$0xff]  ;;  %v965_v50 = vld [vmem:[#allocation2 + $0x1ca] sm:$0xff] }
 0x118   : > { %743 = vst [vmem:[#allocation3 + $0x2b8] sm:$0xff] %v2790_v10  ;;  %v902_v47 = vld [vmem:[#allocation2 + $0x1d0] sm:$0xff] }
 0x119   : > { %744 = vst [vmem:[#allocation3 + $0x368] sm:$0xff] %v2792_v11  ;;  %v934_v49 = vld [vmem:[#allocation2 + $0x1d1] sm:$0xff] }
 0x11a   : > { %745 = vst [vmem:[#allocation3 + $0x3d8] sm:$0xff] %v2794_v12  ;;  %v966_v51 = vld [vmem:[#allocation2 + $0x1d2] sm:$0xff] }
 0x11b   : > { %746 = vst [vmem:[#allocation3 + $0x398] sm:$0xff] %v2797_v13 }
 0x11c   : > { %747 = vst [vmem:[#allocation3 + $0x180] sm:$0xff] %v2800_v14 }
 0x11d   : > { %748 = vst [vmem:[#allocation3 + $0x310] sm:$0xff] %v2803_v15 }
 0x11e   : > { %749 = vst [vmem:[#allocation3 + $0x160] sm:$0xff] %v2806_v16 }
 0x11f   : > { %750 = vst [vmem:[#allocation3 + $0x110] sm:$0xff] %v2809_v17 }
 0x120   : > { %751 = vst [vmem:[#allocation3 + $0x300] sm:$0xff] %v2812_v18 }
 0x121   : > { %752 = vst [vmem:[#allocation3 + $0x290] sm:$0xff] %v2815_v19 }
 0x122   : > { %753 = vst [vmem:[#allocation3 + $0x260] sm:$0xff] %v2818_v20 }
 0x123   : > { %754 = vst [vmem:[#allocation3 + $0xc8] sm:$0xff] %v2821_v21 }
 0x124   : > { %755 = vst [vmem:[#allocation3 + $0x358] sm:$0xff] %v2824_v22 }
 0x125   : > { %756 = vst [vmem:[#allocation3 + $0x3a8] sm:$0xff] %v2827_v23 }
 0x126   : > { %773 = vst [vmem:[#allocation3 + $0x430] sm:$0xff] %v757_v24 }
 0x127   : > { %774 = vst [vmem:[#allocation3 + $0x100] sm:$0xff] %v758_v25 }
 0x128   : > { %775 = vst [vmem:[#allocation3 + $0x458] sm:$0xff] %v2832_v26 }
 0x129   : > { %776 = vst [vmem:[#allocation3 + $0x400] sm:$0xff] %v2834_v27 }
 0x12a   : > { %777 = vst [vmem:[#allocation3 + $0xf0] sm:$0xff] %v2836_v28 }
 0x12b   : > { %778 = vst [vmem:[#allocation3 + $0x1b8] sm:$0xff] %v2839_v29 }
 0x12c   : > { %779 = vst [vmem:[#allocation3 + $0x120] sm:$0xff] %v2842_v30 }
 0x12d   : > { %780 = vst [vmem:[#allocation3 + $0x3c0] sm:$0xff] %v2845_v31 }
 0x12e   : > { %781 = vst [vmem:[#allocation3 + $0x450] sm:$0xff] %v2848_v32 }
 0x12f   : > { %782 = vst [vmem:[#allocation3 + $0x360] sm:$0xff] %v2851_v33 }
 0x130   : > { %783 = vst [vmem:[#allocation3 + $0x2c0] sm:$0xff] %v2854_v34 }
 0x131   : > { %784 = vst [vmem:[#allocation3 + $0xd8] sm:$0xff] %v2857_v35 }
 0x132   : > { %785 = vst [vmem:[#allocation3 + $0x128] sm:$0xff] %v2860_v36 }
 0x133   : > { %786 = vst [vmem:[#allocation3 + $0x2e8] sm:$0xff] %v2863_v37 }
 0x134   : > { %787 = vst [vmem:[#allocation3 + $0x338] sm:$0xff] %v2866_v38 }
 0x135   : > { %788 = vst [vmem:[#allocation3 + $0x2d8] sm:$0xff] %v2869_v39 }
 0x136   : > { %806 = vst [vmem:[#allocation3 + $0x88] sm:$0xff] %v2748_v58 }
 0x137   : > { %807 = vst [vmem:[#allocation3 + $0x268] sm:$0xff] %v2750_v59 }
 0x138   : > { %808 = vst [vmem:[#allocation3 + $0x470] sm:$0xff] %v2752_v60 }
 0x139   : > { %809 = vst [vmem:[#allocation3 + $0x428] sm:$0xff] %v2755_v61 }
 0x13a   : > { %810 = vst [vmem:[#allocation3 + $0x228] sm:$0xff] %v2758_v62 }
 0x13b   : > { %811 = vst [vmem:[#allocation3 + $0x2a8] sm:$0xff] %v2761_v63 }
 0x13c   : > { %812 = vst [vmem:[#allocation3 + $0x1e0] sm:$0xff] %v2764_v0 }
 0x13d   : > { %813 = vst [vmem:[#allocation3 + $0x140] sm:$0xff] %v2767_v1 }
 0x13e   : > { %814 = vst [vmem:[#allocation3 + $0x210] sm:$0xff] %v2770_v2 }
 0x13f   : > { %815 = vst [vmem:[#allocation3 + $0xc0] sm:$0xff] %v2773_v3 }
 0x140   : > { %816 = vst [vmem:[#allocation3 + $0x28] sm:$0xff] %v2776_v4 }
 0x141   : > { %817 = vst [vmem:[#allocation3 + $0x70] sm:$0xff] %v2779_v5 }
 0x142   : > { %818 = vst [vmem:[#allocation3 + $0x3d0] sm:$0xff] %v2782_v6 }
 0x143   : > { %819 = vst [vmem:[#allocation3 + $0x130] sm:$0xff] %v2785_v7 }
 0x144   : > { %820 = vst [vmem:[#allocation3 + $0x2b0] sm:$0xff] %v804_v40 }
 0x145   : > { %821 = vst [vmem:[#allocation3 + $0x278] sm:$0xff] %v805_v41 }
 0x146   : > { %838 = vst [vmem:[#allocation3 + $0x118] sm:$0xff] %v2790_v10 }
 0x147   : > { %839 = vst [vmem:[#allocation3 + $0x3f0] sm:$0xff] %v2792_v11 }
 0x148   : > { %840 = vst [vmem:[#allocation3 + $0x410] sm:$0xff] %v2794_v12 }
 0x149   : > { %841 = vst [vmem:[#allocation3 + $0x20] sm:$0xff] %v2797_v13 }
 0x14a   : > { %842 = vst [vmem:[#allocation3 + $0x138] sm:$0xff] %v2800_v14 }
 0x14b   : > { %843 = vst [vmem:[#allocation3 + $0x250] sm:$0xff] %v2803_v15 }
 0x14c   : > { %844 = vst [vmem:[#allocation3 + $0x158] sm:$0xff] %v2806_v16 }
 0x14d   : > { %845 = vst [vmem:[#allocation3 + $0x440] sm:$0xff] %v2809_v17 }
 0x14e   : > { %846 = vst [vmem:[#allocation3 + $0x178] sm:$0xff] %v2812_v18 }
 0x14f   : > { %847 = vst [vmem:[#allocation3 + $0x370] sm:$0xff] %v2815_v19 }
 0x150   : > { %848 = vst [vmem:[#allocation3 + $0x190] sm:$0xff] %v2818_v20 }
 0x151   : > { %849 = vst [vmem:[#allocation3 + $0x1c0] sm:$0xff] %v2821_v21 }
 0x152   : > { %850 = vst [vmem:[#allocation3 + $0x108] sm:$0xff] %v2824_v22 }
 0x153   : > { %851 = vst [vmem:[#allocation3 + $0x3c8] sm:$0xff] %v2827_v23 }
 0x154   : > { %852 = vst [vmem:[#allocation3 + $0x188] sm:$0xff] %v836_v42 }
 0x155   : > { %853 = vst [vmem:[#allocation3 + $0xd0] sm:$0xff] %v837_v43 }
 0x156   : > { %870 = vst [vmem:[#allocation3 + $0xb0] sm:$0xff] %v2832_v26 }
 0x157   : > { %871 = vst [vmem:[#allocation3 + $0x258] sm:$0xff] %v2834_v27 }
 0x158   : > { %872 = vst [vmem:[#allocation3 + $0x348] sm:$0xff] %v2836_v28 }
 0x159   : > { %873 = vst [vmem:[#allocation3 + $0x48] sm:$0xff] %v2839_v29 }
 0x15a   : > { %874 = vst [vmem:[#allocation3 + $0x40] sm:$0xff] %v2842_v30 }
 0x15b   : > { %875 = vst [vmem:[#allocation3 + $0x1c8] sm:$0xff] %v2845_v31 }
 0x15c   : > { %876 = vst [vmem:[#allocation3 + $0x198] sm:$0xff] %v2848_v32 }
 0x15d   : > { %877 = vst [vmem:[#allocation3 + $0x1d0] sm:$0xff] %v2851_v33 }
 0x15e   : > { %878 = vst [vmem:[#allocation3 + $0x200] sm:$0xff] %v2854_v34 }
 0x15f   : > { %879 = vst [vmem:[#allocation3 + $0x3e8] sm:$0xff] %v2857_v35 }
 0x160   : > { %880 = vst [vmem:[#allocation3 + $0x2f8] sm:$0xff] %v2860_v36 }
 0x161   : > { %881 = vst [vmem:[#allocation3 + $0x438] sm:$0xff] %v2863_v37 }
 0x162   : > { %882 = vst [vmem:[#allocation3 + $0x460] sm:$0xff] %v2866_v38 }
 0x163   : > { %883 = vst [vmem:[#allocation3 + $0xf8] sm:$0xff] %v2869_v39 }
 0x164   : > { %884 = vst [vmem:[#allocation3 + $0x408] sm:$0xff] %v868_v44 }
 0x165   : > { %885 = vst [vmem:[#allocation3 + $0x448] sm:$0xff] %v869_v45 }
 0x166   : > { %903 = vst [vmem:[#allocation3 + $0xa0] sm:$0xff] %v2752_v60 }
 0x167   : > { %904 = vst [vmem:[#allocation3 + $0x3a0] sm:$0xff] %v2755_v61 }
 0x168   : > { %905 = vst [vmem:[#allocation3 + $0x148] sm:$0xff] %v2758_v62 }
 0x169   : > { %906 = vst [vmem:[#allocation3 + $0x350] sm:$0xff] %v2761_v63 }
 0x16a   : > { %907 = vst [vmem:[#allocation3 + $0x170] sm:$0xff] %v2764_v0 }
 0x16b   : > { %908 = vst [vmem:[#allocation3 + $0x330] sm:$0xff] %v2767_v1 }
 0x16c   : > { %909 = vst [vmem:[#allocation3 + $0xe8] sm:$0xff] %v2770_v2 }
 0x16d   : > { %910 = vst [vmem:[#allocation3] sm:$0xff] %v2773_v3 }
 0x16e   : > { %911 = vst [vmem:[#allocation3 + $0x478] sm:$0xff] %v2776_v4 }
 0x16f   : > { %912 = vst [vmem:[#allocation3 + $0x208] sm:$0xff] %v2779_v5 }
 0x170   : > { %913 = vst [vmem:[#allocation3 + $0x320] sm:$0xff] %v2782_v6 }
 0x171   : > { %914 = vst [vmem:[#allocation3 + $0x340] sm:$0xff] %v2785_v7 }
 0x172   : > { %915 = vst [vmem:[#allocation3 + $0x380] sm:$0xff] %v804_v40 }
 0x173   : > { %916 = vst [vmem:[#allocation3 + $0x230] sm:$0xff] %v805_v41 }
 0x174   : > { %917 = vst [vmem:[#allocation3 + $0x18] sm:$0xff] %v901_v46 }
 0x175   : > { %918 = vst [vmem:[#allocation3 + $0x168] sm:$0xff] %v902_v47 }
 0x176   : > { %935 = vst [vmem:[#allocation3 + $0x58] sm:$0xff] %v2794_v12 }
 0x177   : > { %936 = vst [vmem:[#allocation3 + $0x468] sm:$0xff] %v2797_v13 }
 0x178   : > { %937 = vst [vmem:[#allocation3 + $0x280] sm:$0xff] %v2800_v14 }
 0x179   : > { %938 = vst [vmem:[#allocation3 + $0x328] sm:$0xff] %v2803_v15 }
 0x17a   : > { %939 = vst [vmem:[#allocation3 + $0x390] sm:$0xff] %v2806_v16 }
 0x17b   : > { %940 = vst [vmem:[#allocation3 + $0x2d0] sm:$0xff] %v2809_v17 }
 0x17c   : > { %941 = vst [vmem:[#allocation3 + $0x78] sm:$0xff] %v2812_v18 }
 0x17d   : > { %942 = vst [vmem:[#allocation3 + $0x270] sm:$0xff] %v2815_v19 }
 0x17e   : > { %943 = vst [vmem:[#allocation3 + $0x388] sm:$0xff] %v2818_v20 }
 0x17f   : > { %944 = vst [vmem:[#allocation3 + $0x3e0] sm:$0xff] %v2821_v21 }
 0x180   : > { %945 = vst [vmem:[#allocation3 + $0x2f0] sm:$0xff] %v2824_v22 }
 0x181   : > { %946 = vst [vmem:[#allocation3 + $0x2a0] sm:$0xff] %v2827_v23 }
 0x182   : > { %947 = vst [vmem:[#allocation3 + $0xa8] sm:$0xff] %v836_v42 }
 0x183   : > { %948 = vst [vmem:[#allocation3 + $0x308] sm:$0xff] %v837_v43 }
 0x184   : > { %949 = vst [vmem:[#allocation3 + $0x3b0] sm:$0xff] %v933_v48 }
 0x185   : > { %950 = vst [vmem:[#allocation3 + $0x3f8] sm:$0xff] %v934_v49 }
 0x186   : > { %967 = vst [vmem:[#allocation3 + $0x3b8] sm:$0xff] %v2836_v28 }
 0x187   : > { %968 = vst [vmem:[#allocation3 + $0x98] sm:$0xff] %v2839_v29 }
 0x188   : > { %969 = vst [vmem:[#allocation3 + $0x378] sm:$0xff] %v2842_v30 }
 0x189   : > { %970 = vst [vmem:[#allocation3 + $0x1f8] sm:$0xff] %v2845_v31 }
 0x18a   : > { %971 = vst [vmem:[#allocation3 + $0x80] sm:$0xff] %v2848_v32 }
 0x18b   : > { %972 = vst [vmem:[#allocation3 + $0x1f0] sm:$0xff] %v2851_v33 }
 0x18c   : > { %973 = vst [vmem:[#allocation3 + $0x8] sm:$0xff] %v2854_v34 }
 0x18d   : > { %974 = vst [vmem:[#allocation3 + $0x1a8] sm:$0xff] %v2857_v35 }
 0x18e   : > { %975 = vst [vmem:[#allocation3 + $0x218] sm:$0xff] %v2860_v36 }
 0x18f   : > { %976 = vst [vmem:[#allocation3 + $0x220] sm:$0xff] %v2863_v37 }
 0x190   : > { %977 = vst [vmem:[#allocation3 + $0x240] sm:$0xff] %v2866_v38 }
 0x191   : > { %978 = vst [vmem:[#allocation3 + $0x2e0] sm:$0xff] %v2869_v39 }
 0x192   : > { %979 = vst [vmem:[#allocation3 + $0x1a0] sm:$0xff] %v868_v44 }
 0x193   : > { %980 = vst [vmem:[#allocation3 + $0xe0] sm:$0xff] %v869_v45 }
 0x194   : > { %981 = vst [vmem:[#allocation3 + $0x318] sm:$0xff] %v965_v50 }
 0x195   : > { %982 = vst [vmem:[#allocation3 + $0x60] sm:$0xff] %v966_v51 }
 0x196 PF: > { %v1142_v52 = vld [vmem:[%s3576_s1 + $0x78] sm:$0xff]  ;;  %v1141_v53 = vld [vmem:[%s3576_s1 + $0x70] sm:$0xff]  ;;  %v1140_v54 = vld [vmem:[%s3576_s1 + $0x68] sm:$0xff]  ;;  %s2105_s5 = sshll.u32 %s2308_s15, 4  ;;  %s2099_s6 = sshll.u32 %s2312_s16, 5 }
 0x197   : > { %2106 = vmatpush.msra.mxu1 %v1142_v52  ;;  %2107 = vmatpush.msra.mxu2 %v1142_v52  ;;  %v1139_v55 = vld [vmem:[%s3576_s1 + $0x60] sm:$0xff]  ;;  %v1138_v56 = vld [vmem:[%s3576_s1 + $0x58] sm:$0xff]  ;;  %v1137_v57 = vld [vmem:[%s3576_s1 + $0x50] sm:$0xff]  ;;  %s1890_s7 = sadd.s32 %s2105_s5, %s2099_s6  ;;  %s1893_s20 = sshll.u32 %s2427_s11, 4  ;;  %s1894_s20 = int_to_ptr.vmem [resolvable:$true] %s1893_s20 }
 0x198   : > { %2108 = vmatpush.msra.mxu3 %v1142_v52  ;;  %1275 = vmatpush.msra.mxu0 %v1142_v52  ;;  %v1136_v58 = vld [vmem:[%s3576_s1 + $0x48] sm:$0xff]  ;;  %v1135_v59 = vld [vmem:[%s3576_s1 + $0x40] sm:$0xff]  ;;  %v1134_v60 = vld [vmem:[%s3576_s1 + $0x38] sm:$0xff]  ;;  %s2100_s8 = sshll.u32 %s1890_s7, 3  ;;  %s1877_s24 = scalar_lea.sflag [#allocation6], %s167_s4 }
 0x199   : > { %2109 = vmatpush.msra.mxu1 %v1141_v53  ;;  %2110 = vmatpush.msra.mxu2 %v1141_v53  ;;  %v1133_v61 = vld [vmem:[%s3576_s1 + $0x30] sm:$0xff]  ;;  %v1132_v62 = vld [vmem:[%s3576_s1 + $0x28] sm:$0xff]  ;;  %v1131_v63 = vld [vmem:[%s3576_s1 + $0x20] sm:$0xff]  ;;  %s1892_s16 = scalar_lea.hbm %s3578_s3, %s2100_s8  ;;  %s2248_s5 = scalar_lea.hbm %s3578_s3, 512 }
 0x19a   : > { %2111 = vmatpush.msra.mxu3 %v1141_v53  ;;  %1276 = vmatpush.msra.mxu0 %v1141_v53  ;;  %v1130_v0 = vld [vmem:[%s3576_s1 + $0x18] sm:$0xff]  ;;  %v1129_v1 = vld [vmem:[%s3576_s1 + $0x10] sm:$0xff]  ;;  %v1128_v2 = vld [vmem:[%s3576_s1 + $0x8] sm:$0xff]  ;;  %s1895_s21 = sshll.u32 %s1892_s16, 4  ;;  %s1896_s21 = int_to_ptr.hbm [resolvable:$true] %s1895_s21 }
 0x19b   : > { %2112 = vmatpush.msra.mxu1 %v1140_v54  ;;  %2113 = vmatpush.msra.mxu2 %v1140_v54  ;;  %v1127_v3 = vld [vmem:[%s3576_s1] sm:$0xff]  ;;  %v1019_v4 = vld [vmem:[#allocation3 + $0x150] sm:$0xff]  ;;  %v1174_v6 = vld [vmem:[%s3576_s1 + $0x178] sm:$0xff]  ;;  %s2242_s27 = sshra.s32 %s1896_s21, 4  ;;  %s2243_s27 = int_to_ptr.hbm [resolvable:$true] %s2242_s27 }
 0x19c   : > { %2114 = vmatpush.msra.mxu3 %v1140_v54  ;;  %1277 = vmatpush.msra.mxu0 %v1140_v54  ;;  %v1055_v5 = vld [vmem:[#allocation3 + $0x30] sm:$0xff]  ;;  %v1158_v7 = vld [vmem:[%s3576_s1 + $0xf8] sm:$0xff]  ;;  %v1091_v8 = vld [vmem:[#allocation3 + $0x288] sm:$0xff]  ;;  %s2244_s28 = scalar_lea.hbm %s2243_s27, 128  ;;  %p2249_p9 = scmp.lt.s32.totalorder %s2243_s27, %s3578_s3 }
 0x19d   : > { %2115 = vmatpush.msra.mxu1 %v1139_v55  ;;  %2116 = vmatpush.msra.mxu2 %v1139_v55  ;;  %v1173_v9 = vld [vmem:[%s3576_s1 + $0x170] sm:$0xff]  ;;  %v1190_v10 = vld [vmem:[%s3576_s1 + $0x1f8] sm:$0xff]  ;;  %v1172_v12 = vld [vmem:[%s3576_s1 + $0x168] sm:$0xff]  ;;  %p2245_p5 = scmp.ne.s32.totalorder %s2243_s27, %s2244_s28  ;;  %p2250_p10 = scmp.lt.s32.totalorder %s2248_s5, %s2244_s28 }
 0x19e   : > { %2117 = vmatpush.msra.mxu3 %v1139_v55  ;;  %1278 = vmatpush.msra.mxu0 %v1139_v55  ;;  %v1157_v11 = vld [vmem:[%s3576_s1 + $0xf0] sm:$0xff]  ;;  %v1156_v14 = vld [vmem:[%s3576_s1 + $0xe8] sm:$0xff]  ;;  %v983_v15 = vld [vmem:[#allocation3 + $0x1d8] sm:$0xff] }
 0x19f   : > { %2118 = vmatpush.msra.mxu1 %v1138_v56  ;;  %2119 = vmatpush.msra.mxu2 %v1138_v56  ;;  %v1189_v13 = vld [vmem:[%s3576_s1 + $0x1f0] sm:$0xff]  ;;  %v1171_v16 = vld [vmem:[%s3576_s1 + $0x160] sm:$0xff]  ;;  %v1188_v17 = vld [vmem:[%s3576_s1 + $0x1e8] sm:$0xff]  ;;  %p2246_p6 = pnand %p2245_p5, %p2399_p3  ;;  %p2251_p11 = por %p2250_p10, %p2249_p9 }
 0x1a0   : > { %2120 = vmatpush.msra.mxu3 %v1138_v56  ;;  %1279 = vmatpush.msra.mxu0 %v1138_v56  ;;  %v1155_v18 = vld [vmem:[%s3576_s1 + $0xe0] sm:$0xff]  ;;  %v1064_v19 = vld [vmem:[#allocation3 + $0x418] sm:$0xff]  ;;  %v1100_v24 = vld [vmem:[#allocation3 + $0x248] sm:$0xff] }
 0x1a1   : > { %2121 = vmatpush.msra.mxu1 %v1137_v57  ;;  %2122 = vmatpush.msra.mxu2 %v1137_v57  ;;  %v1028_v20 = vld [vmem:[#allocation3 + $0x238] sm:$0xff]  ;;  %v1187_v22 = vld [vmem:[%s3576_s1 + $0x1e0] sm:$0xff]  ;;  %v1169_v25 = vld [vmem:[%s3576_s1 + $0x150] sm:$0xff]  ;;  %p2247_p7 = pneg %p2246_p6 }
 0x1a2   : > { %2123 = vmatpush.msra.mxu3 %v1137_v57  ;;  %1280 = vmatpush.msra.mxu0 %v1137_v57  ;;  %v1170_v21 = vld [vmem:[%s3576_s1 + $0x158] sm:$0xff]  ;;  %v1153_v28 = vld [vmem:[%s3576_s1 + $0xd0] sm:$0xff]  ;;  %v1168_v29 = vld [vmem:[%s3576_s1 + $0x148] sm:$0xff] }
 0x1a3   : > { %2124 = vmatpush.msra.mxu1 %v1136_v58  ;;  %2125 = vmatpush.msra.mxu2 %v1136_v58  ;;  %v1154_v23 = vld [vmem:[%s3576_s1 + $0xd8] sm:$0xff]  ;;  %v1185_v30 = vld [vmem:[%s3576_s1 + $0x1d0] sm:$0xff]  ;;  %v1152_v32 = vld [vmem:[%s3576_s1 + $0xc8] sm:$0xff]  ;;  %p2252_p12 = pnand %p2251_p11, %p2247_p7 }
 0x1a4   : > { %2126 = vmatpush.msra.mxu3 %v1136_v58  ;;  %1281 = vmatpush.msra.mxu0 %v1136_v58  ;;  %v1186_v26 = vld [vmem:[%s3576_s1 + $0x1d8] sm:$0xff]  ;;  %v1205_v31 = vld [vmem:[%s3576_s1 + $0x270] sm:$0xff]  ;;  %v1167_v33 = vld [vmem:[%s3576_s1 + $0x140] sm:$0xff] }
 0x1a5   : > { %2127 = vmatpush.msra.mxu1 %v1135_v59  ;;  %2128 = vmatpush.msra.mxu2 %v1135_v59  ;;  %v1206_v27 = vld [vmem:[%s3576_s1 + $0x278] sm:$0xff]  ;;  %v1184_v34 = vld [vmem:[%s3576_s1 + $0x1c8] sm:$0xff]  ;;  %v1151_v36 = vld [vmem:[%s3576_s1 + $0xc0] sm:$0xff] }
 0x1a6   : > { %2129 = vmatpush.msra.mxu3 %v1135_v59  ;;  %1282 = vmatpush.msra.mxu0 %v1135_v59  ;;  %v1204_v35 = vld [vmem:[%s3576_s1 + $0x268] sm:$0xff]  ;;  %v1073_v37 = vld [vmem:[#allocation3 + $0xb8] sm:$0xff]  ;;  %v1037_v38 = vld [vmem:[#allocation3 + $0x420] sm:$0xff] }
 0x1a7   : > { %2130 = vmatpush.msra.mxu1 %v1134_v60  ;;  %2131 = vmatpush.msra.mxu2 %v1134_v60  ;;  %v1166_v39 = vld [vmem:[%s3576_s1 + $0x138] sm:$0xff]  ;;  %v1183_v40 = vld [vmem:[%s3576_s1 + $0x1c0] sm:$0xff]  ;;  %v992_v43 = vld [vmem:[#allocation3 + $0x1e8] sm:$0xff] }
 0x1a8   : > { %2132 = vmatpush.msra.mxu3 %v1134_v60  ;;  %1283 = vmatpush.msra.mxu0 %v1134_v60  ;;  %v1203_v41 = vld [vmem:[%s3576_s1 + $0x260] sm:$0xff]  ;;  %v1150_v42 = vld [vmem:[%s3576_s1 + $0xb8] sm:$0xff]  ;;  %v1109_v44 = vld [vmem:[#allocation3 + $0x1b0] sm:$0xff] }
 0x1a9   : > { %2133 = vmatpush.msra.mxu1 %v1133_v61  ;;  %2134 = vmatpush.msra.mxu2 %v1133_v61  ;;  %v1165_v45 = vld [vmem:[%s3576_s1 + $0x130] sm:$0xff]  ;;  %v1182_v46 = vld [vmem:[%s3576_s1 + $0x1b8] sm:$0xff]  ;;  %v1164_v49 = vld [vmem:[%s3576_s1 + $0x128] sm:$0xff] }
 0x1aa   : > { %2135 = vmatpush.msra.mxu3 %v1133_v61  ;;  %1284 = vmatpush.msra.mxu0 %v1133_v61  ;;  %v1202_v47 = vld [vmem:[%s3576_s1 + $0x258] sm:$0xff]  ;;  %v1149_v48 = vld [vmem:[%s3576_s1 + $0xb0] sm:$0xff]  ;;  %v1148_v52 = vld [vmem:[%s3576_s1 + $0xa8] sm:$0xff] }
 0x1ab   : > { %2136 = vmatpush.msra.mxu1 %v1132_v62  ;;  %2137 = vmatpush.msra.mxu2 %v1132_v62  ;;  %v1181_v50 = vld [vmem:[%s3576_s1 + $0x1b0] sm:$0xff]  ;;  %v1163_v53 = vld [vmem:[%s3576_s1 + $0x120] sm:$0xff]  ;;  %v1180_v54 = vld [vmem:[%s3576_s1 + $0x1a8] sm:$0xff] }
 0x1ac   : > { %2138 = vmatpush.msra.mxu3 %v1132_v62  ;;  %1285 = vmatpush.msra.mxu0 %v1132_v62  ;;  %v1201_v51 = vld [vmem:[%s3576_s1 + $0x250] sm:$0xff]  ;;  %v1200_v55 = vld [vmem:[%s3576_s1 + $0x248] sm:$0xff]  ;;  %v1147_v56 = vld [vmem:[%s3576_s1 + $0xa0] sm:$0xff] }
 0x1ad   : > { %2139 = vmatpush.msra.mxu1 %v1131_v63  ;;  %2140 = vmatpush.msra.mxu2 %v1131_v63  ;;  %v1082_v57 = vld [vmem:[#allocation3 + $0x38] sm:$0xff]  ;;  %v1046_v58 = vld [vmem:[#allocation3 + $0x10] sm:$0xff]  ;;  %v1179_v60 = vld [vmem:[%s3576_s1 + $0x1a0] sm:$0xff] }
 0x1ae   : > { %2141 = vmatpush.msra.mxu3 %v1131_v63  ;;  %1286 = vmatpush.msra.mxu0 %v1131_v63  ;;  %v1162_v59 = vld [vmem:[%s3576_s1 + $0x118] sm:$0xff]  ;;  %v1199_v61 = vld [vmem:[%s3576_s1 + $0x240] sm:$0xff]  ;;  %v1001_v63 = vld [vmem:[#allocation3 + $0x90] sm:$0xff] }
 0x1af   : > { %2142 = vmatpush.msra.mxu1 %v1130_v0  ;;  %2143 = vmatpush.msra.mxu2 %v1130_v0  ;;  %v1146_v62 = vld [vmem:[%s3576_s1 + $0x98] sm:$0xff] }
 0x1b0   : > { %2144 = vmatpush.msra.mxu3 %v1130_v0  ;;  %1287 = vmatpush.msra.mxu0 %v1130_v0  ;;  %v1118_v0 = vld [vmem:[#allocation3 + $0x298] sm:$0xff] }
 0x1b1   : > { %2145 = vmatpush.msra.mxu1 %v1129_v1  ;;  %2146 = vmatpush.msra.mxu2 %v1129_v1 }
 0x1b2   : > { %2147 = vmatpush.msra.mxu3 %v1129_v1  ;;  %1288 = vmatpush.msra.mxu0 %v1129_v1  ;;  %v1161_v1 = vld [vmem:[%s3576_s1 + $0x110] sm:$0xff] }
 0x1b3   : > { %2148 = vmatpush.msra.mxu1 %v1128_v2  ;;  %2149 = vmatpush.msra.mxu2 %v1128_v2 }
 0x1b4   : > { %2150 = vmatpush.msra.mxu3 %v1128_v2  ;;  %1289 = vmatpush.msra.mxu0 %v1128_v2  ;;  %v1178_v2 = vld [vmem:[%s3576_s1 + $0x198] sm:$0xff] }
 0x1b5   : > { %2151 = vmatpush.msra.mxu1 %v1127_v3  ;;  %2152 = vmatpush.msra.mxu2 %v1127_v3 }
 0x1b6   : > { %1303 = vmatmul.f32.vlgmr.msra.gmra.mxu1 %v1019_v4  ;;  %1315 = vmatmul.f32.vlgmr.msra.gmra.mxu2 %v1055_v5  ;;  %v1145_v4 = vld [vmem:[%s3576_s1 + $0x90] sm:$0xff]  ;;  %v1160_v5 = vld [vmem:[%s3576_s1 + $0x108] sm:$0xff] }
 0x1b7   : > { %1405 = vmatpush.msrb.mxu2 %v1174_v6  ;;  %2153 = vmatpush.msra.mxu3 %v1127_v3  ;;  %v1177_v6 = vld [vmem:[%s3576_s1 + $0x190] sm:$0xff] }
 0x1b8   : > { %1340 = vmatpush.msrb.mxu1 %v1158_v7  ;;  %1327 = vmatmul.f32.vlgmr.msra.gmra.mxu3 %v1091_v8  ;;  %v1197_v7 = vld [vmem:[%s3576_s1 + $0x230] sm:$0xff]  ;;  %v1144_v8 = vld [vmem:[%s3576_s1 + $0x88] sm:$0xff] }
 0x1b9   : > { %1406 = vmatpush.msrb.mxu2 %v1173_v9  ;;  %1470 = vmatpush.msrb.mxu3 %v1190_v10  ;;  %v1159_v9 = vld [vmem:[%s3576_s1 + $0x100] sm:$0xff]  ;;  %v1176_v10 = vld [vmem:[%s3576_s1 + $0x188] sm:$0xff] }
 0x1ba   : > { %1341 = vmatpush.msrb.mxu1 %v1157_v11  ;;  %1290 = vmatpush.msra.mxu0 %v1127_v3  ;;  %v1198_v3 = vld [vmem:[%s3576_s1 + $0x238] sm:$0xff]  ;;  %v1196_v11 = vld [vmem:[%s3576_s1 + $0x228] sm:$0xff] }
 0x1bb   : > { %1407 = vmatpush.msrb.mxu2 %v1172_v12  ;;  %1471 = vmatpush.msrb.mxu3 %v1189_v13  ;;  %v1143_v12 = vld [vmem:[%s3576_s1 + $0x80] sm:$0xff]  ;;  %v985_v13 = vld [vmem:[#allocation3 + $0x430] sm:$0xff] }
 0x1bc   : > { %1342 = vmatpush.msrb.mxu1 %v1156_v14  ;;  %1291 = vmatmul.f32.vlgmr.msra.gmra.mxu0 %v983_v15  ;;  %v984_v14 = vld [vmem:[#allocation3 + $0x68] sm:$0xff]  ;;  %v1175_v15 = vld [vmem:[%s3576_s1 + $0x180] sm:$0xff] }
 0x1bd   : > { %1408 = vmatpush.msrb.mxu2 %v1171_v16  ;;  %1472 = vmatpush.msrb.mxu3 %v1188_v17  ;;  %v1195_v16 = vld [vmem:[%s3576_s1 + $0x220] sm:$0xff]  ;;  %v1238_v17 = vld [vmem:[%s3576_s1 + $0x378] sm:$0xff] }
 0x1be   : > { %1343 = vmatpush.msrb.mxu1 %v1155_v18  ;;  %1318 = vmatmul.f32.gmra.mxu2 %v1064_v19  ;;  %v1010_v18 = vld [vmem:[#allocation3 + $0x2c8] sm:$0xff] }
 0x1bf   : > { %1306 = vmatmul.f32.gmra.mxu1 %v1028_v20  ;;  %1409 = vmatpush.msrb.mxu2 %v1170_v21  ;;  %v986_v19 = vld [vmem:[#allocation3 + $0x88] sm:$0xff]  ;;  %v1194_v20 = vld [vmem:[%s3576_s1 + $0x218] sm:$0xff] }
 0x1c0   : > { %1473 = vmatpush.msrb.mxu3 %v1187_v22  ;;  %1344 = vmatpush.msrb.mxu1 %v1154_v23  ;;  %v1254_v21 = vld [vmem:[%s3576_s1 + $0x3f8] sm:$0xff]  ;;  %v1237_v23 = vld [vmem:[%s3576_s1 + $0x370] sm:$0xff] }
 0x1c1   : > { %1330 = vmatmul.f32.gmra.mxu3 %v1100_v24  ;;  %1410 = vmatpush.msrb.mxu2 %v1169_v25  ;;  %v1222_v22 = vld [vmem:[%s3576_s1 + $0x2f8] sm:$0xff]  ;;  %v1193_v24 = vld [vmem:[%s3576_s1 + $0x210] sm:$0xff] }
 0x1c2   : > { %1474 = vmatpush.msrb.mxu3 %v1186_v26  ;;  %1535 = vmatpush.msrb.mxu0 %v1206_v27  ;;  %v1253_v25 = vld [vmem:[%s3576_s1 + $0x3f0] sm:$0xff]  ;;  %v1236_v27 = vld [vmem:[%s3576_s1 + $0x368] sm:$0xff] }
 0x1c3   : > { %1345 = vmatpush.msrb.mxu1 %v1153_v28  ;;  %1411 = vmatpush.msrb.mxu2 %v1168_v29  ;;  %v1221_v26 = vld [vmem:[%s3576_s1 + $0x2f0] sm:$0xff]  ;;  %v1192_v28 = vld [vmem:[%s3576_s1 + $0x208] sm:$0xff]  ;;  %v994_v29 = vld [vmem:[#allocation3 + $0x100] sm:$0xff] }
 0x1c4   : > { %1475 = vmatpush.msrb.mxu3 %v1185_v30  ;;  %1536 = vmatpush.msrb.mxu0 %v1205_v31  ;;  %v993_v30 = vld [vmem:[#allocation3 + $0x50] sm:$0xff]  ;;  %v1252_v31 = vld [vmem:[%s3576_s1 + $0x3e8] sm:$0xff] }
 0x1c5   : > { %1346 = vmatpush.msrb.mxu1 %v1152_v32  ;;  %1412 = vmatpush.msrb.mxu2 %v1167_v33  ;;  %v1191_v32 = vld [vmem:[%s3576_s1 + $0x200] sm:$0xff]  ;;  %v1220_v33 = vld [vmem:[%s3576_s1 + $0x2e8] sm:$0xff] }
 0x1c6   : > { %1476 = vmatpush.msrb.mxu3 %v1184_v34  ;;  %1537 = vmatpush.msrb.mxu0 %v1204_v35  ;;  %v995_v34 = vld [vmem:[#allocation3 + $0x268] sm:$0xff]  ;;  %v987_v35 = vld [vmem:[#allocation3 + $0x118] sm:$0xff] }
 0x1c7   : > { %1347 = vmatpush.msrb.mxu1 %v1151_v36  ;;  %1321 = vmatmul.f32.gmra.mxu2 %v1073_v37  ;;  %v1270_v36 = vld [vmem:[%s3576_s1 + $0x478] sm:$0xff]  ;;  %v1235_v37 = vld [vmem:[%s3576_s1 + $0x360] sm:$0xff] }
 0x1c8   : > { %1309 = vmatmul.f32.gmra.mxu1 %v1037_v38  ;;  %1413 = vmatpush.msrb.mxu2 %v1166_v39  ;;  %v1251_v38 = vld [vmem:[%s3576_s1 + $0x3e0] sm:$0xff] }
 0x1c9   : > { %1477 = vmatpush.msrb.mxu3 %v1183_v40  ;;  %1538 = vmatpush.msrb.mxu0 %v1203_v41  ;;  %v1219_v39 = vld [vmem:[%s3576_s1 + $0x2e0] sm:$0xff]  ;;  %v1269_v40 = vld [vmem:[%s3576_s1 + $0x470] sm:$0xff]  ;;  %v1234_v41 = vld [vmem:[%s3576_s1 + $0x358] sm:$0xff] }
 0x1ca   : > { %1348 = vmatpush.msrb.mxu1 %v1150_v42  ;;  %1294 = vmatmul.f32.gmra.mxu0 %v992_v43  ;;  %v1250_v42 = vld [vmem:[%s3576_s1 + $0x3d8] sm:$0xff] }
 0x1cb   : > { %1333 = vmatmul.f32.gmra.mxu3 %v1109_v44  ;;  %1414 = vmatpush.msrb.mxu2 %v1165_v45  ;;  %v1218_v43 = vld [vmem:[%s3576_s1 + $0x2d8] sm:$0xff]  ;;  %v1268_v45 = vld [vmem:[%s3576_s1 + $0x468] sm:$0xff] }
 0x1cc   : > { %1478 = vmatpush.msrb.mxu3 %v1182_v46  ;;  %1539 = vmatpush.msrb.mxu0 %v1202_v47  ;;  %v1003_v44 = vld [vmem:[#allocation3 + $0x458] sm:$0xff]  ;;  %v1233_v47 = vld [vmem:[%s3576_s1 + $0x350] sm:$0xff] }
 0x1cd   : > { %1349 = vmatpush.msrb.mxu1 %v1149_v48  ;;  %1415 = vmatpush.msrb.mxu2 %v1164_v49  ;;  %v1002_v46 = vld [vmem:[#allocation3 + $0x2b8] sm:$0xff]  ;;  %v1267_v48 = vld [vmem:[%s3576_s1 + $0x460] sm:$0xff]  ;;  %v1249_v49 = vld [vmem:[%s3576_s1 + $0x3d0] sm:$0xff] }
 0x1ce   : > { %1479 = vmatpush.msrb.mxu3 %v1181_v50  ;;  %1540 = vmatpush.msrb.mxu0 %v1201_v51  ;;  %v1004_v50 = vld [vmem:[#allocation3 + $0x470] sm:$0xff] }
 0x1cf   : > { %1350 = vmatpush.msrb.mxu1 %v1148_v52  ;;  %1416 = vmatpush.msrb.mxu2 %v1163_v53  ;;  %v996_v51 = vld [vmem:[#allocation3 + $0x3f0] sm:$0xff]  ;;  %v1266_v52 = vld [vmem:[%s3576_s1 + $0x458] sm:$0xff] }
 0x1d0   : > { %1480 = vmatpush.msrb.mxu3 %v1180_v54  ;;  %1541 = vmatpush.msrb.mxu0 %v1200_v55  ;;  %v1217_v53 = vld [vmem:[%s3576_s1 + $0x2d0] sm:$0xff]  ;;  %v1232_v54 = vld [vmem:[%s3576_s1 + $0x348] sm:$0xff] }
 0x1d1   : > { %1351 = vmatpush.msrb.mxu1 %v1147_v56  ;;  %1324 = vmatmul.f32.gmra.mxu2 %v1082_v57  ;;  %v1248_v55 = vld [vmem:[%s3576_s1 + $0x3c8] sm:$0xff]  ;;  %v1265_v56 = vld [vmem:[%s3576_s1 + $0x450] sm:$0xff] }
 0x1d2   : > { %1312 = vmatmul.f32.gmra.mxu1 %v1046_v58  ;;  %1417 = vmatpush.msrb.mxu2 %v1162_v59  ;;  %v1216_v57 = vld [vmem:[%s3576_s1 + $0x2c8] sm:$0xff]  ;;  %v1012_v58 = vld [vmem:[#allocation3 + $0x400] sm:$0xff] }
 0x1d3   : > { %1481 = vmatpush.msrb.mxu3 %v1179_v60  ;;  %1542 = vmatpush.msrb.mxu0 %v1199_v61  ;;  %v1011_v59 = vld [vmem:[#allocation3 + $0x368] sm:$0xff]  ;;  %v1005_v61 = vld [vmem:[#allocation3 + $0x410] sm:$0xff] }
 0x1d4   : > { %1352 = vmatpush.msrb.mxu1 %v1146_v62  ;;  %1297 = vmatmul.f32.gmra.mxu0 %v1001_v63  ;;  %v1013_v60 = vld [vmem:[#allocation3 + $0x428] sm:$0xff]  ;;  %v1231_v62 = vld [vmem:[%s3576_s1 + $0x340] sm:$0xff] }
 0x1d5   : > { %1336 = vmatmul.f32.gmra.mxu3 %v1118_v0  ;;  %1418 = vmatpush.msrb.mxu2 %v1161_v1  ;;  %v1247_v63 = vld [vmem:[%s3576_s1 + $0x3c0] sm:$0xff]  ;;  %v1264_v0 = vld [vmem:[%s3576_s1 + $0x448] sm:$0xff] }
 0x1d6   : > { %1482 = vmatpush.msrb.mxu3 %v1178_v2  ;;  %1543 = vmatpush.msrb.mxu0 %v1198_v3  ;;  %v1215_v1 = vld [vmem:[%s3576_s1 + $0x2c0] sm:$0xff]  ;;  %v1021_v2 = vld [vmem:[#allocation3 + $0xf0] sm:$0xff]  ;;  %v1020_v3 = vld [vmem:[#allocation3 + $0x3d8] sm:$0xff] }
 0x1d7   : > { %1353 = vmatpush.msrb.mxu1 %v1145_v4  ;;  %1419 = vmatpush.msrb.mxu2 %v1160_v5  ;;  %v1022_v4 = vld [vmem:[#allocation3 + $0x228] sm:$0xff]  ;;  %v1014_v5 = vld [vmem:[#allocation3 + $0x20] sm:$0xff] }
 0x1d8   : > { %1483 = vmatpush.msrb.mxu3 %v1177_v6  ;;  %1544 = vmatpush.msrb.mxu0 %v1197_v7  ;;  %v1230_v6 = vld [vmem:[%s3576_s1 + $0x338] sm:$0xff] }
 0x1d9   : > { %1354 = vmatpush.msrb.mxu1 %v1144_v8  ;;  %1420 = vmatpush.msrb.mxu2 %v1159_v9  ;;  %v1246_v7 = vld [vmem:[%s3576_s1 + $0x3b8] sm:$0xff]  ;;  %v1263_v8 = vld [vmem:[%s3576_s1 + $0x440] sm:$0xff] }
 0x1da   : > { %1484 = vmatpush.msrb.mxu3 %v1176_v10  ;;  %1545 = vmatpush.msrb.mxu0 %v1196_v11  ;;  %v1214_v9 = vld [vmem:[%s3576_s1 + $0x2b8] sm:$0xff] }
 0x1db   : > { %1355 = vmatpush.msrb.mxu1 %v1143_v12  ;;  %1421 = vmatmul.f32.vlgmr.msrb.gmra.mxu2 %v985_v13  ;;  %v1030_v10 = vld [vmem:[#allocation3 + $0x1b8] sm:$0xff]  ;;  %v1031_v12 = vld [vmem:[#allocation3 + $0x2a8] sm:$0xff] }
 0x1dc   : > { %1356 = vmatmul.f32.vlgmr.msrb.gmra.mxu1 %v984_v14  ;;  %1485 = vmatpush.msrb.mxu3 %v1175_v15  ;;  %v1029_v11 = vld [vmem:[#allocation3 + $0x398] sm:$0xff]  ;;  %v1229_v14 = vld [vmem:[%s3576_s1 + $0x330] sm:$0xff] }
 0x1dd   : > { %1546 = vmatpush.msrb.mxu0 %v1195_v16  ;;  %1665 = vmatpush.msra.mxu2 %v1238_v17  ;;  %v1023_v13 = vld [vmem:[#allocation3 + $0x138] sm:$0xff]  ;;  %v1245_v15 = vld [vmem:[%s3576_s1 + $0x3b0] sm:$0xff] }
 0x1de   : > { %1300 = vmatmul.f32.gmra.mxu0 %v1010_v18  ;;  %1486 = vmatmul.f32.vlgmr.msrb.gmra.mxu3 %v986_v19  ;;  %v1262_v16 = vld [vmem:[%s3576_s1 + $0x438] sm:$0xff]  ;;  %v1213_v17 = vld [vmem:[%s3576_s1 + $0x2b0] sm:$0xff]  ;;  %v1039_v18 = vld [vmem:[#allocation3 + $0x120] sm:$0xff] }
 0x1df   : > { %1547 = vmatpush.msrb.mxu0 %v1194_v20  ;;  %1730 = vmatpush.msra.mxu3 %v1254_v21  ;;  %v1038_v19 = vld [vmem:[#allocation3 + $0x180] sm:$0xff]  ;;  %v1032_v21 = vld [vmem:[#allocation3 + $0x250] sm:$0xff] }
 0x1e0   : > { %1600 = vmatpush.msra.mxu1 %v1222_v22  ;;  %1666 = vmatpush.msra.mxu2 %v1237_v23  ;;  %v1040_v20 = vld [vmem:[#allocation3 + $0x1e0] sm:$0xff]  ;;  %v1228_v22 = vld [vmem:[%s3576_s1 + $0x328] sm:$0xff] }
 0x1e1   : > { %1548 = vmatpush.msrb.mxu0 %v1193_v24  ;;  %1731 = vmatpush.msra.mxu3 %v1253_v25  ;;  %v1244_v23 = vld [vmem:[%s3576_s1 + $0x3a8] sm:$0xff]  ;;  %v1261_v24 = vld [vmem:[%s3576_s1 + $0x430] sm:$0xff] }
 0x1e2   : > { %1601 = vmatpush.msra.mxu1 %v1221_v26  ;;  %1667 = vmatpush.msra.mxu2 %v1236_v27  ;;  %v1212_v25 = vld [vmem:[%s3576_s1 + $0x2a8] sm:$0xff]  ;;  %v1048_v26 = vld [vmem:[#allocation3 + $0x3c0] sm:$0xff]  ;;  %v1047_v27 = vld [vmem:[#allocation3 + $0x310] sm:$0xff] }
 0x1e3   : > { %1549 = vmatpush.msrb.mxu0 %v1192_v28  ;;  %1424 = vmatmul.f32.gmra.mxu2 %v994_v29  ;;  %v1049_v28 = vld [vmem:[#allocation3 + $0x140] sm:$0xff]  ;;  %v1041_v29 = vld [vmem:[#allocation3 + $0x158] sm:$0xff] }
 0x1e4   : > { %1359 = vmatmul.f32.gmra.mxu1 %v993_v30  ;;  %1732 = vmatpush.msra.mxu3 %v1252_v31  ;;  %v1227_v30 = vld [vmem:[%s3576_s1 + $0x320] sm:$0xff] }
 0x1e5   : > { %1550 = vmatpush.msrb.mxu0 %v1191_v32  ;;  %1602 = vmatpush.msra.mxu1 %v1220_v33  ;;  %v1243_v31 = vld [vmem:[%s3576_s1 + $0x3a0] sm:$0xff]  ;;  %v1260_v32 = vld [vmem:[%s3576_s1 + $0x428] sm:$0xff] }
 0x1e6   : > { %1489 = vmatmul.f32.gmra.mxu3 %v995_v34  ;;  %1551 = vmatmul.f32.vlgmr.msrb.gmra.mxu0 %v987_v35  ;;  %v1211_v33 = vld [vmem:[%s3576_s1 + $0x2a0] sm:$0xff]  ;;  %v1057_v34 = vld [vmem:[#allocation3 + $0x450] sm:$0xff] }
 0x1e7   : > { %1795 = vmatpush.msra.mxu0 %v1270_v36  ;;  %1668 = vmatpush.msra.mxu2 %v1235_v37  ;;  %v1056_v35 = vld [vmem:[#allocation3 + $0x160] sm:$0xff]  ;;  %v1058_v36 = vld [vmem:[#allocation3 + $0x210] sm:$0xff] }
 0x1e8   : > { %1733 = vmatpush.msra.mxu3 %v1251_v38  ;;  %1603 = vmatpush.msra.mxu1 %v1219_v39  ;;  %v1050_v37 = vld [vmem:[#allocation3 + $0x440] sm:$0xff]  ;;  %v1226_v38 = vld [vmem:[%s3576_s1 + $0x318] sm:$0xff] }
 0x1e9   : > { %1796 = vmatpush.msra.mxu0 %v1269_v40  ;;  %1669 = vmatpush.msra.mxu2 %v1234_v41  ;;  %v1242_v39 = vld [vmem:[%s3576_s1 + $0x398] sm:$0xff]  ;;  %v1259_v40 = vld [vmem:[%s3576_s1 + $0x420] sm:$0xff] }
 0x1ea   : > { %1734 = vmatpush.msra.mxu3 %v1250_v42  ;;  %1604 = vmatpush.msra.mxu1 %v1218_v43  ;;  %v1210_v41 = vld [vmem:[%s3576_s1 + $0x298] sm:$0xff]  ;;  %v1066_v42 = vld [vmem:[#allocation3 + $0x360] sm:$0xff]  ;;  %v1065_v43 = vld [vmem:[#allocation3 + $0x110] sm:$0xff] }
 0x1eb   : > { %1427 = vmatmul.f32.gmra.mxu2 %v1003_v44  ;;  %1797 = vmatpush.msra.mxu0 %v1268_v45  ;;  %v1067_v44 = vld [vmem:[#allocation3 + $0xc0] sm:$0xff]  ;;  %v1059_v45 = vld [vmem:[#allocation3 + $0x178] sm:$0xff] }
 0x1ec   : > { %1362 = vmatmul.f32.gmra.mxu1 %v1002_v46  ;;  %1670 = vmatpush.msra.mxu2 %v1233_v47  ;;  %v1225_v46 = vld [vmem:[%s3576_s1 + $0x310] sm:$0xff] }
 0x1ed   : > { %1798 = vmatpush.msra.mxu0 %v1267_v48  ;;  %1735 = vmatpush.msra.mxu3 %v1249_v49  ;;  %v1241_v47 = vld [vmem:[%s3576_s1 + $0x390] sm:$0xff]  ;;  %v1258_v48 = vld [vmem:[%s3576_s1 + $0x418] sm:$0xff] }
 0x1ee   : > { %1492 = vmatmul.f32.gmra.mxu3 %v1004_v50  ;;  %1554 = vmatmul.f32.gmra.mxu0 %v996_v51  ;;  %v1209_v49 = vld [vmem:[%s3576_s1 + $0x290] sm:$0xff]  ;;  %v1075_v50 = vld [vmem:[#allocation3 + $0x2c0] sm:$0xff] }
 0x1ef   : > { %1799 = vmatpush.msra.mxu0 %v1266_v52  ;;  %1605 = vmatpush.msra.mxu1 %v1217_v53  ;;  %v1074_v51 = vld [vmem:[#allocation3 + $0x300] sm:$0xff]  ;;  %v1076_v52 = vld [vmem:[#allocation3 + $0x28] sm:$0xff]  ;;  %v1068_v53 = vld [vmem:[#allocation3 + $0x370] sm:$0xff] }
 0x1f0   : > { %1671 = vmatpush.msra.mxu2 %v1232_v54  ;;  %1736 = vmatpush.msra.mxu3 %v1248_v55  ;;  %v1224_v54 = vld [vmem:[%s3576_s1 + $0x308] sm:$0xff] }
 0x1f1   : > { %1800 = vmatpush.msra.mxu0 %v1265_v56  ;;  %1606 = vmatpush.msra.mxu1 %v1216_v57  ;;  %v1240_v55 = vld [vmem:[%s3576_s1 + $0x388] sm:$0xff]  ;;  %v1257_v56 = vld [vmem:[%s3576_s1 + $0x410] sm:$0xff] }
 0x1f2   : > { %1672 = vmatpush.msra.mxu2 %v1231_v62  ;;  %1737 = vmatpush.msra.mxu3 %v1247_v63  ;;  %v1208_v57 = vld [vmem:[%s3576_s1 + $0x288] sm:$0xff]  ;;  %v1223_v63 = vld [vmem:[%s3576_s1 + $0x300] sm:$0xff] }
 0x1f3   : > { %1430 = vmatmul.f32.gmra.mxu2 %v1012_v58  ;;  %1801 = vmatpush.msra.mxu0 %v1264_v0  ;;  %v1084_v58 = vld [vmem:[#allocation3 + $0xd8] sm:$0xff]  ;;  %v1239_v0 = vld [vmem:[%s3576_s1 + $0x380] sm:$0xff] }
 0x1f4   : > { %1365 = vmatmul.f32.gmra.mxu1 %v1011_v59  ;;  %1673 = vmatpush.msra.mxu2 %v1230_v6  ;;  %v1083_v59 = vld [vmem:[#allocation3 + $0x290] sm:$0xff] }
 0x1f5   : > { %1607 = vmatpush.msra.mxu1 %v1215_v1  ;;  %1738 = vmatpush.msra.mxu3 %v1246_v7  ;;  %v1256_v1 = vld [vmem:[%s3576_s1 + $0x408] sm:$0xff]  ;;  %v1094_v6 = vld [vmem:[#allocation3 + $0x3d0] sm:$0xff]  ;;  %v1086_v7 = vld [vmem:[#allocation3 + $0x1c0] sm:$0xff] }
 0x1f6   : > { %1495 = vmatmul.f32.gmra.mxu3 %v1013_v60  ;;  %1557 = vmatmul.f32.gmra.mxu0 %v1005_v61  ;;  %v1085_v60 = vld [vmem:[#allocation3 + $0x70] sm:$0xff] }
 0x1f7   : > { %1802 = vmatpush.msra.mxu0 %v1263_v8  ;;  %1608 = vmatpush.msra.mxu1 %v1214_v9  ;;  %v1077_v61 = vld [vmem:[#allocation3 + $0x190] sm:$0xff] }
 0x1f8   : > { %1674 = vmatpush.msra.mxu2 %v1229_v14  ;;  %1739 = vmatpush.msra.mxu3 %v1245_v15  ;;  %v1103_v15 = vld [vmem:[#allocation3 + $0x130] sm:$0xff] }
 0x1f9   : > { %1803 = vmatpush.msra.mxu0 %v1262_v16  ;;  %1609 = vmatpush.msra.mxu1 %v1213_v17  ;;  %v1095_v16 = vld [vmem:[#allocation3 + $0x108] sm:$0xff] }
 0x1fa   : > { %1675 = vmatpush.msra.mxu2 %v1228_v22  ;;  %1740 = vmatpush.msra.mxu3 %v1244_v23  ;;  %v1110_v22 = vld [vmem:[#allocation3 + $0x358] sm:$0xff] }
 0x1fb   : > { %1433 = vmatmul.f32.gmra.mxu2 %v1021_v2  ;;  %1804 = vmatpush.msra.mxu0 %v1261_v24  ;;  %v1207_v2 = vld [vmem:[%s3576_s1 + $0x280] sm:$0xff]  ;;  %v1112_v24 = vld [vmem:[#allocation3 + $0x2b0] sm:$0xff] }
 0x1fc   : > { %1368 = vmatmul.f32.gmra.mxu1 %v1020_v3  ;;  %1676 = vmatpush.msra.mxu2 %v1227_v30  ;;  %v1093_v3 = vld [vmem:[#allocation3 + $0x128] sm:$0xff]  ;;  %v1120_v30 = vld [vmem:[#allocation3 + $0x2d8] sm:$0xff] }
 0x1fd   : > { %1610 = vmatpush.msra.mxu1 %v1212_v25  ;;  %1741 = vmatpush.msra.mxu3 %v1243_v31  ;;  %v1104_v25 = vld [vmem:[#allocation3 + $0x3c8] sm:$0xff] }
 0x1fe   : > { %1498 = vmatmul.f32.gmra.mxu3 %v1022_v4  ;;  %1560 = vmatmul.f32.gmra.mxu0 %v1014_v5  ;;  %v1092_v4 = vld [vmem:[#allocation3 + $0x260] sm:$0xff] }
 0x1ff   : > { %1805 = vmatpush.msra.mxu0 %v1260_v32  ;;  %1611 = vmatpush.msra.mxu1 %v1211_v33  ;;  %v1119_v32 = vld [vmem:[#allocation3 + $0x3a8] sm:$0xff]  ;;  %v1121_v33 = vld [vmem:[#allocation3 + $0x278] sm:$0xff] }
 0x200   : > { %1677 = vmatpush.msra.mxu2 %v1226_v38  ;;  %1742 = vmatpush.msra.mxu3 %v1242_v39  ;;  %v989_v38 = vld [vmem:[#allocation3 + $0xa0] sm:$0xff] }
 0x201   : > { %1806 = vmatpush.msra.mxu0 %v1259_v40  ;;  %1612 = vmatpush.msra.mxu1 %v1210_v41  ;;  %v988_v41 = vld [vmem:[#allocation3 + $0xb0] sm:$0xff] }
 0x202   : > { %1678 = vmatpush.msra.mxu2 %v1225_v46  ;;  %1743 = vmatpush.msra.mxu3 %v1241_v47 }
 0x203   : > { %1436 = vmatmul.f32.gmra.mxu2 %v1030_v10  ;;  %1807 = vmatpush.msra.mxu0 %v1258_v48 }
 0x204   : > { %1371 = vmatmul.f32.gmra.mxu1 %v1029_v11  ;;  %1679 = vmatpush.msra.mxu2 %v1224_v54  ;;  %v1255_v11 = vld [vmem:[%s3576_s1 + $0x400] sm:$0xff] }
 0x205   : > { %1613 = vmatpush.msra.mxu1 %v1209_v49  ;;  %1744 = vmatpush.msra.mxu3 %v1240_v55  ;;  %v998_v49 = vld [vmem:[#allocation3 + $0x3a0] sm:$0xff] }
 0x206   : > { %1501 = vmatmul.f32.gmra.mxu3 %v1031_v12  ;;  %1563 = vmatmul.f32.gmra.mxu0 %v1023_v13  ;;  %v1102_v12 = vld [vmem:[#allocation3 + $0x2e8] sm:$0xff] }
 0x207   : > { %1808 = vmatpush.msra.mxu0 %v1257_v56  ;;  %1614 = vmatpush.msra.mxu1 %v1208_v57  ;;  %v1101_v13 = vld [vmem:[#allocation3 + $0xc8] sm:$0xff]  ;;  %v991_v57 = vld [vmem:[#allocation3 + $0x3b8] sm:$0xff] }
 0x208   : > { %1680 = vmatpush.msra.mxu2 %v1223_v63  ;;  %1745 = vmatpush.msra.mxu3 %v1239_v0  ;;  %v999_v56 = vld [vmem:[#allocation3 + $0x468] sm:$0xff] }
 0x209   : > { %1809 = vmatpush.msra.mxu0 %v1256_v1  ;;  %1615 = vmatpush.msra.mxu1 %v1207_v2  ;;  %v1006_v1 = vld [vmem:[#allocation3 + $0x348] sm:$0xff] }
 0x20b   : > { %1439 = vmatmul.f32.gmra.mxu2 %v1039_v18  ;;  %1810 = vmatpush.msra.mxu0 %v1255_v11 }
 0x20c   : > { %1374 = vmatmul.f32.gmra.mxu1 %v1038_v19 }
 0x20e   : > { %1504 = vmatmul.f32.gmra.mxu3 %v1040_v20  ;;  %1566 = vmatmul.f32.gmra.mxu0 %v1032_v21  ;;  %v1111_v20 = vld [vmem:[#allocation3 + $0x338] sm:$0xff]  ;;  %v3401_v21 = vld [vmem:[%s3577_s2] ss:$0 sm:$0xff] }
 0x213   : > { %1442 = vmatmul.f32.gmra.mxu2 %v1048_v26 }
 0x214   : > { %1377 = vmatmul.f32.gmra.mxu1 %v1047_v27 }
 0x216   : > { %1507 = vmatmul.f32.gmra.mxu3 %v1049_v28  ;;  %1569 = vmatmul.f32.gmra.mxu0 %v1041_v29 }
 0x21b   : > { %1445 = vmatmul.f32.gmra.mxu2 %v1057_v34  ;;  %v1113_v34 = vld [vmem:[#allocation3 + $0x188] sm:$0xff] }
 0x21c   : > { %1380 = vmatmul.f32.gmra.mxu1 %v1056_v35 }
 0x21e   : > { %1510 = vmatmul.f32.gmra.mxu3 %v1058_v36  ;;  %1572 = vmatmul.f32.gmra.mxu0 %v1050_v37 }
 0x223   : > { %1448 = vmatmul.f32.gmra.mxu2 %v1066_v42 }
 0x224   : > { %1383 = vmatmul.f32.gmra.mxu1 %v1065_v43 }
 0x226   : > { %1513 = vmatmul.f32.gmra.mxu3 %v1067_v44  ;;  %1575 = vmatmul.f32.gmra.mxu0 %v1059_v45  ;;  %v1122_v44 = vld [vmem:[#allocation3 + $0xd0] sm:$0xff]  ;;  %v990_v45 = vld [vmem:[#allocation3 + $0x58] sm:$0xff] }
 0x22b   : > { %1451 = vmatmul.f32.gmra.mxu2 %v1075_v50 }
 0x22c   : > { %1386 = vmatmul.f32.gmra.mxu1 %v1074_v51 }
 0x22e   : > { %1516 = vmatmul.f32.gmra.mxu3 %v1076_v52  ;;  %1578 = vmatmul.f32.gmra.mxu0 %v1068_v53  ;;  %v997_v52 = vld [vmem:[#allocation3 + $0x258] sm:$0xff] }
 0x233   : > { %1454 = vmatmul.f32.gmra.mxu2 %v1084_v58  ;;  %v3369_v62 = vpop.f32.mrf.mxu1 }
 0x234   : > { %1389 = vmatmul.f32.gmra.mxu1 %v1083_v59 }
 0x236   : > { %1519 = vmatmul.f32.gmra.mxu3 %v1085_v60  ;;  %1581 = vmatmul.f32.gmra.mxu0 %v1077_v61  ;;  %v1007_v61 = vld [vmem:[#allocation3 + $0x148] sm:$0xff] }
 0x239   : > { %v3383_v5 = vpop.f32.mrf.mxu2  ;;  %v1292_v10 = vpop.f32.mrf.mxu0 }
 0x23a   : > { %v1293_v42 = vadd.f32 %v3401_v21, %v1292_v10 }
 0x23b   : > { %1457 = vmatmul.f32.gmra.mxu2 %v1093_v3  ;;  %v3385_v8 = vpop.f32.mrf.mxu3 }
 0x23c   : > { %1392 = vmatmul.f32.gmra.mxu1 %v1092_v4  ;;  %v3387_v9 = vpop.f32.mrf.mxu1 }
 0x23e   : > { %1522 = vmatmul.f32.gmra.mxu3 %v1094_v6  ;;  %1584 = vmatmul.f32.gmra.mxu0 %v1086_v7  ;;  %v1008_v6 = vld [vmem:[#allocation3 + $0x280] sm:$0xff]  ;;  %v1000_v7 = vld [vmem:[#allocation3 + $0x98] sm:$0xff] }
 0x241   : > { %v3392_v14 = vpop.f32.mrf.mxu2 }
 0x243   : > { %1460 = vmatmul.f32.gmra.mxu2 %v1102_v12 }
 0x244   : > { %1395 = vmatmul.f32.gmra.mxu1 %v1101_v13  ;;  %v3394_v17 = vpop.f32.mrf.mxu3  ;;  %v1016_v13 = vld [vmem:[#allocation3 + $0x350] sm:$0xff] }
 0x245   : > { %v3396_v18 = vpop.f32.mrf.mxu1 }
 0x246   : > { %1525 = vmatmul.f32.gmra.mxu3 %v1103_v15  ;;  %1587 = vmatmul.f32.gmra.mxu0 %v1095_v16 }
 0x247   : > { %v1295_v19 = vpop.f32.mrf.mxu0 }
 0x248   : > { %v1296_v54 = vadd.f32 %v3401_v21, %v1295_v19  ;;  %v1015_v19 = vld [vmem:[#allocation3 + $0x48] sm:$0xff] }
 0x24a   : > { %v1322_v23 = vpop.f32.mrf.mxu2 }
 0x24b   : > { %1463 = vmatmul.f32.gmra.mxu2 %v1111_v20  ;;  %v3404_v26 = vadd.f32 %v3401_v21, %v1322_v23 }
 0x24c   : > { %1398 = vmatmul.f32.gmra.mxu1 %v1110_v22 }
 0x24e   : > { %1528 = vmatmul.f32.gmra.mxu3 %v1112_v24  ;;  %1590 = vmatmul.f32.gmra.mxu0 %v1104_v25  ;;  %v1334_v27 = vpop.f32.mrf.mxu3  ;;  %v1017_v24 = vld [vmem:[#allocation3 + $0x328] sm:$0xff]  ;;  %v1009_v25 = vld [vmem:[#allocation3 + $0x378] sm:$0xff] }
 0x24f   : > { %v3406_v28 = vpop.f32.mrf.mxu1  ;;  %v3409_v29 = vadd.f32 %v3401_v21, %v1334_v27 }
 0x251   : > { %v1298_v31 = vpop.f32.mrf.mxu0 }
 0x252   : > { %v1299_v3 = vadd.f32 %v3401_v21, %v1298_v31 }
 0x253   : > { %1466 = vmatmul.f32.gmra.mxu2 %v1120_v30 }
 0x254   : > { %1401 = vmatmul.f32.gmra.mxu1 %v1119_v32  ;;  %v1325_v35 = vpop.f32.mrf.mxu2  ;;  %v1025_v32 = vld [vmem:[#allocation3 + $0x170] sm:$0xff] }
 0x255   : > { %v3412_v36 = vadd.f32 %v3401_v21, %v1325_v35  ;;  %v1024_v35 = vld [vmem:[#allocation3 + $0x40] sm:$0xff] }
 0x256   : > { %1531 = vmatmul.f32.gmra.mxu3 %v1121_v33  ;;  %1593 = vmatmul.f32.gmra.mxu0 %v1113_v34 }
 0x258   : > { %v1337_v37 = vpop.f32.mrf.mxu3 }
 0x259   : > { %v3415_v39 = vadd.f32 %v3401_v21, %v1337_v37  ;;  %v1357_v40 = vpop.f32.mrf.mxu1 }
 0x25a   : > { %v1358_v46 = vadd.f32 %v1357_v40, %v1293_v42  ;;  %v1018_v42 = vld [vmem:[#allocation3 + $0x1f8] sm:$0xff] }
 0x25b   : > { %v1301_v43 = vpop.f32.mrf.mxu0  ;;  %1681 = vmatmul.f32.vlgmr.msra.gmra.mxu2 %v989_v38  ;;  %v1305_v38 = vadd.f32 %v3401_v21, %v3369_v62  ;;  %v1308_v62 = vadd.f32 %v3401_v21, %v3387_v9  ;;  %v1311_v9 = vadd.f32 %v3401_v21, %v3396_v18  ;;  %v1314_v18 = vadd.f32 %v3401_v21, %v3406_v28 }
 0x25c   : > { %1616 = vmatmul.f32.vlgmr.msra.gmra.mxu1 %v988_v41  ;;  %v1302_v22 = vadd.f32 %v3401_v21, %v1301_v43  ;;  %v1026_v41 = vld [vmem:[#allocation3 + $0x390] sm:$0xff] }
 0x25e   : > { %1596 = vmatmul.f32.gmra.mxu0 %v1122_v44  ;;  %1746 = vmatmul.f32.vlgmr.msra.gmra.mxu3 %v990_v45  ;;  %v1422_v47 = vpop.f32.mrf.mxu2 }
 0x25f   : > { %v1423_v48 = vadd.f32 %v1422_v47, %v1358_v46  ;;  %v1034_v46 = vld [vmem:[#allocation3 + $0x330] sm:$0xff] }
 0x261   : > { %v1360_v50 = vpop.f32.mrf.mxu1  ;;  %v1487_v51 = vpop.f32.mrf.mxu3 }
 0x262   : > { %v3418_v53 = vadd.f32 %v1487_v51, %v1423_v48  ;;  %v1361_v58 = vadd.f32 %v1360_v50, %v1296_v54  ;;  %v1027_v54 = vld [vmem:[#allocation3 + $0x80] sm:$0xff] }
 0x263   : > { %v3421_v55 = vpop.f32.mrf.mxu0  ;;  %1684 = vmatmul.f32.gmra.mxu2 %v998_v49  ;;  %v1033_v49 = vld [vmem:[#allocation3 + $0x1c8] sm:$0xff] }
 0x264   : > { %1619 = vmatmul.f32.gmra.mxu1 %v997_v52  ;;  %v1035_v52 = vld [vmem:[#allocation3 + $0x2d0] sm:$0xff] }
 0x266   : > { %1749 = vmatmul.f32.gmra.mxu3 %v999_v56  ;;  %1811 = vmatmul.f32.vlgmr.msra.gmra.mxu0 %v991_v57  ;;  %v1425_v59 = vpop.f32.mrf.mxu2 }
 0x267   : > { %v1426_v60 = vadd.f32 %v1425_v59, %v1361_v58  ;;  %v1043_v59 = vld [vmem:[#allocation3 + $0xe8] sm:$0xff] }
 0x269   : > { %v1363_v63 = vpop.f32.mrf.mxu1  ;;  %v1490_v0 = vpop.f32.mrf.mxu3 }
 0x26a   : > { %v3423_v2 = vadd.f32 %v1490_v0, %v1426_v60  ;;  %v1364_v10 = vadd.f32 %v1363_v63, %v1299_v3  ;;  %v1042_v63 = vld [vmem:[#allocation3 + $0x198] sm:$0xff] }
 0x26b   : > { %v3426_v4 = vpop.f32.mrf.mxu0  ;;  %1687 = vmatmul.f32.gmra.mxu2 %v1007_v61  ;;  %v1044_v3 = vld [vmem:[#allocation3 + $0x78] sm:$0xff] }
 0x26c   : > { %1622 = vmatmul.f32.gmra.mxu1 %v1006_v1 }
 0x26e   : > { %1752 = vmatmul.f32.gmra.mxu3 %v1008_v6  ;;  %1814 = vmatmul.f32.gmra.mxu0 %v1000_v7  ;;  %v1428_v11 = vpop.f32.mrf.mxu2  ;;  %v1036_v6 = vld [vmem:[#allocation3 + $0x1f0] sm:$0xff] }
 0x26f   : > { %v1429_v12 = vadd.f32 %v1428_v11, %v1364_v10 }
 0x271   : > { %v1366_v15 = vpop.f32.mrf.mxu1  ;;  %v1493_v16 = vpop.f32.mrf.mxu3 }
 0x272   : > { %v3428_v20 = vadd.f32 %v1493_v16, %v1429_v12  ;;  %v1367_v27 = vadd.f32 %v1366_v15, %v1302_v22  ;;  %v1052_v12 = vld [vmem:[#allocation3] sm:$0xff]  ;;  %v1051_v16 = vld [vmem:[#allocation3 + $0x1d0] sm:$0xff] }
 0x273   : > { %v3431_v23 = vpop.f32.mrf.mxu0  ;;  %1690 = vmatmul.f32.gmra.mxu2 %v1016_v13 }
 0x274   : > { %1625 = vmatmul.f32.gmra.mxu1 %v1015_v19 }
 0x276   : > { %1755 = vmatmul.f32.gmra.mxu3 %v1017_v24  ;;  %1817 = vmatmul.f32.gmra.mxu0 %v1009_v25  ;;  %v1431_v30 = vpop.f32.mrf.mxu2  ;;  %v1053_v24 = vld [vmem:[#allocation3 + $0x270] sm:$0xff]  ;;  %v1045_v25 = vld [vmem:[#allocation3 + $0x8] sm:$0xff] }
 0x277   : > { %v1432_v31 = vadd.f32 %v1431_v30, %v1367_v27 }
 0x279   : > { %v1369_v33 = vpop.f32.mrf.mxu1  ;;  %v1496_v34 = vpop.f32.mrf.mxu3 }
 0x27a   : > { %v3433_v37 = vadd.f32 %v1496_v34, %v1432_v31  ;;  %v1370_v43 = vadd.f32 %v1369_v33, %v1305_v38  ;;  %v1061_v33 = vld [vmem:[#allocation3 + $0x478] sm:$0xff]  ;;  %v1060_v38 = vld [vmem:[#allocation3 + $0x200] sm:$0xff] }
 0x27b   : > { %v3437_v40 = vpop.f32.mrf.mxu0  ;;  %1693 = vmatmul.f32.gmra.mxu2 %v1025_v32  ;;  %v1317_v32 = vadd.f32 %v3401_v21, %v3383_v5  ;;  %v1320_v5 = vadd.f32 %v3401_v21, %v3392_v14 }
 0x27c   : > { %1628 = vmatmul.f32.gmra.mxu1 %v1024_v35 }
 0x27e   : > { %1758 = vmatmul.f32.gmra.mxu3 %v1026_v41  ;;  %1820 = vmatmul.f32.gmra.mxu0 %v1018_v42  ;;  %v1434_v44 = vpop.f32.mrf.mxu2 }
 0x27f   : > { %v1435_v45 = vadd.f32 %v1434_v44, %v1370_v43  ;;  %v1062_v43 = vld [vmem:[#allocation3 + $0x388] sm:$0xff] }
 0x280   : > { %v1054_v44 = vld [vmem:[#allocation3 + $0x1a8] sm:$0xff] }
 0x281   : > { %v1372_v47 = vpop.f32.mrf.mxu1  ;;  %v1499_v48 = vpop.f32.mrf.mxu3 }
 0x282   : > { %v3439_v50 = vadd.f32 %v1499_v48, %v1435_v45  ;;  %v1373_v56 = vadd.f32 %v1372_v47, %v1308_v62  ;;  %v1070_v47 = vld [vmem:[#allocation3 + $0x208] sm:$0xff] }
 0x283   : > { %v3443_v51 = vpop.f32.mrf.mxu0  ;;  %1696 = vmatmul.f32.gmra.mxu2 %v1034_v46  ;;  %v1069_v62 = vld [vmem:[#allocation3 + $0x3e8] sm:$0xff] }
 0x284   : > { %1631 = vmatmul.f32.gmra.mxu1 %v1033_v49 }
 0x286   : > { %1761 = vmatmul.f32.gmra.mxu3 %v1035_v52  ;;  %1823 = vmatmul.f32.gmra.mxu0 %v1027_v54  ;;  %v1437_v57 = vpop.f32.mrf.mxu2 }
 0x287   : > { %v1438_v58 = vadd.f32 %v1437_v57, %v1373_v56  ;;  %v1071_v57 = vld [vmem:[#allocation3 + $0x3e0] sm:$0xff] }
 0x289   : > { %v1375_v60 = vpop.f32.mrf.mxu1  ;;  %v1502_v61 = vpop.f32.mrf.mxu3 }
 0x28a   : > { %v3445_v0 = vadd.f32 %v1502_v61, %v1438_v58  ;;  %v1376_v7 = vadd.f32 %v1375_v60, %v1311_v9  ;;  %v1063_v58 = vld [vmem:[#allocation3 + $0x218] sm:$0xff] }
 0x28b   : > { %v3449_v1 = vpop.f32.mrf.mxu0  ;;  %1699 = vmatmul.f32.gmra.mxu2 %v1043_v59 }
 0x28c   : > { %1634 = vmatmul.f32.gmra.mxu1 %v1042_v63  ;;  %v1079_v63 = vld [vmem:[#allocation3 + $0x320] sm:$0xff] }
 0x28e   : > { %1764 = vmatmul.f32.gmra.mxu3 %v1044_v3  ;;  %1826 = vmatmul.f32.gmra.mxu0 %v1036_v6  ;;  %v1440_v10 = vpop.f32.mrf.mxu2  ;;  %v1078_v3 = vld [vmem:[#allocation3 + $0x2f8] sm:$0xff] }
 0x28f   : > { %v1441_v11 = vadd.f32 %v1440_v10, %v1376_v7 }
 0x291   : > { %v1378_v13 = vpop.f32.mrf.mxu1  ;;  %v1505_v15 = vpop.f32.mrf.mxu3 }
 0x292   : > { %v3451_v19 = vadd.f32 %v1505_v15, %v1441_v11  ;;  %v1379_v27 = vadd.f32 %v1378_v13, %v1314_v18  ;;  %v1080_v11 = vld [vmem:[#allocation3 + $0x2f0] sm:$0xff]  ;;  %v1088_v18 = vld [vmem:[#allocation3 + $0x340] sm:$0xff] }
 0x293   : > { %v3455_v22 = vpop.f32.mrf.mxu0  ;;  %1702 = vmatmul.f32.gmra.mxu2 %v1052_v12  ;;  %v1072_v12 = vld [vmem:[#allocation3 + $0x220] sm:$0xff] }
 0x294   : > { %1637 = vmatmul.f32.gmra.mxu1 %v1051_v16 }
 0x296   : > { %1767 = vmatmul.f32.gmra.mxu3 %v1053_v24  ;;  %1829 = vmatmul.f32.gmra.mxu0 %v1045_v25  ;;  %v1443_v30 = vpop.f32.mrf.mxu2 }
 0x297   : > { %v1444_v31 = vadd.f32 %v1443_v30, %v1379_v27  ;;  %v1087_v27 = vld [vmem:[#allocation3 + $0x438] sm:$0xff] }
 0x299   : > { %v1381_v34 = vpop.f32.mrf.mxu1  ;;  %v1508_v35 = vpop.f32.mrf.mxu3 }
 0x29a   : > { %v1382_v41 = vadd.f32 %v1381_v34, %v1317_v32  ;;  %v3459_v28 = vadd.f32 %v1508_v35, %v1444_v31  ;;  %v1089_v32 = vld [vmem:[#allocation3 + $0x2a0] sm:$0xff] }
 0x29b   : > { %v3461_v42 = vpop.f32.mrf.mxu0  ;;  %1705 = vmatmul.f32.gmra.mxu2 %v1061_v33  ;;  %v1081_v33 = vld [vmem:[#allocation3 + $0x240] sm:$0xff] }
 0x29c   : > { %1640 = vmatmul.f32.gmra.mxu1 %v1060_v38 }
 0x29e   : > { %1770 = vmatmul.f32.gmra.mxu3 %v1062_v43  ;;  %1832 = vmatmul.f32.gmra.mxu0 %v1054_v44  ;;  %v1446_v45 = vpop.f32.mrf.mxu2  ;;  %v1097_v43 = vld [vmem:[#allocation3 + $0x380] sm:$0xff] }
 0x29f   : > { %v1447_v46 = vadd.f32 %v1446_v45, %v1382_v41  ;;  %v1329_v41 = vadd.f32 %v3401_v21, %v3385_v8  ;;  %v1332_v8 = vadd.f32 %v3401_v21, %v3394_v17  ;;  %v1114_v21 = vld [vmem:[#allocation3 + $0x408] sm:$0xff] }
 0x2a1   : > { %v1384_v48 = vpop.f32.mrf.mxu1  ;;  %v1511_v49 = vpop.f32.mrf.mxu3 }
 0x2a2   : > { %v1385_v52 = vadd.f32 %v1384_v48, %v1320_v5  ;;  %v1512_v54 = vadd.f32 %v1511_v49, %v1447_v46  ;;  %v1096_v46 = vld [vmem:[#allocation3 + $0x460] sm:$0xff]  ;;  %v1098_v48 = vld [vmem:[#allocation3 + $0xa8] sm:$0xff] }
 0x2a3   : > { %v1576_v56 = vpop.f32.mrf.mxu0  ;;  %1708 = vmatmul.f32.gmra.mxu2 %v1070_v47  ;;  %v1090_v49 = vld [vmem:[#allocation3 + $0x2e0] sm:$0xff] }
 0x2a4   : > { %v3465_v59 = vadd.f32 %v1576_v56, %v1512_v54  ;;  %1643 = vmatmul.f32.gmra.mxu1 %v1069_v62  ;;  %v1106_v56 = vld [vmem:[#allocation3 + $0x230] sm:$0xff] }
 0x2a6   : > { %1773 = vmatmul.f32.gmra.mxu3 %v1071_v57  ;;  %1835 = vmatmul.f32.gmra.mxu0 %v1063_v58  ;;  %v1449_v60 = vpop.f32.mrf.mxu2 }
 0x2a7   : > { %v1450_v61 = vadd.f32 %v1449_v60, %v1385_v52  ;;  %v1105_v60 = vld [vmem:[#allocation3 + $0xf8] sm:$0xff] }
 0x2a9   : > { %v1387_v9 = vpop.f32.mrf.mxu1  ;;  %v1514_v14 = vpop.f32.mrf.mxu3 }
 0x2aa   : > { %v1388_v6 = vadd.f32 %v1387_v9, %v3404_v26  ;;  %v1515_v7 = vadd.f32 %v1514_v14, %v1450_v61  ;;  %v1107_v14 = vld [vmem:[#allocation3 + $0x308] sm:$0xff] }
 0x2ab   : > { %v1579_v10 = vpop.f32.mrf.mxu0  ;;  %1711 = vmatmul.f32.gmra.mxu2 %v1079_v63 }
 0x2ac   : > { %v3468_v13 = vadd.f32 %v1579_v10, %v1515_v7  ;;  %1646 = vmatmul.f32.gmra.mxu1 %v1078_v3  ;;  %v1099_v3 = vld [vmem:[#allocation3 + $0x1a0] sm:$0xff] }
 0x2ae   : > { %1776 = vmatmul.f32.gmra.mxu3 %v1080_v11  ;;  %1838 = vmatmul.f32.gmra.mxu0 %v1072_v12  ;;  %v1452_v15 = vpop.f32.mrf.mxu2  ;;  %v1115_v11 = vld [vmem:[#allocation3 + $0x18] sm:$0xff] }
 0x2af   : > { %v1453_v16 = vadd.f32 %v1452_v15, %v1388_v6 }
 0x2b1   : > { %v1390_v24 = vpop.f32.mrf.mxu1  ;;  %v1517_v25 = vpop.f32.mrf.mxu3 }
 0x2b2   : > { %v1391_v30 = vadd.f32 %v1390_v24, %v3412_v36  ;;  %v1518_v31 = vadd.f32 %v1517_v25, %v1453_v16  ;;  %v1116_v24 = vld [vmem:[#allocation3 + $0x3b0] sm:$0xff]  ;;  %v1108_v25 = vld [vmem:[#allocation3 + $0xe0] sm:$0xff] }
 0x2b3   : > { %v1582_v26 = vpop.f32.mrf.mxu0  ;;  %1714 = vmatmul.f32.gmra.mxu2 %v1088_v18 }
 0x2b4   : > { %v3471_v34 = vadd.f32 %v1582_v26, %v1518_v31  ;;  %1649 = vmatmul.f32.gmra.mxu1 %v1087_v27  ;;  %v1124_v26 = vld [vmem:[#allocation3 + $0x168] sm:$0xff] }
 0x2b6   : > { %1779 = vmatmul.f32.gmra.mxu3 %v1089_v32  ;;  %1841 = vmatmul.f32.gmra.mxu0 %v1081_v33  ;;  %v1455_v35 = vpop.f32.mrf.mxu2 }
 0x2b7   : > { %v1456_v38 = vadd.f32 %v1455_v35, %v1391_v30  ;;  %v1123_v35 = vld [vmem:[#allocation3 + $0x448] sm:$0xff] }
 0x2b9   : > { %v1393_v44 = vpop.f32.mrf.mxu1  ;;  %v1520_v45 = vpop.f32.mrf.mxu3 }
 0x2ba   : > { %v1394_v36 = vadd.f32 %v1393_v44, %v1329_v41  ;;  %v1521_v5 = vadd.f32 %v1520_v45, %v1456_v38  ;;  %v1117_v44 = vld [vmem:[#allocation3 + $0x318] sm:$0xff] }
 0x2bb   : > { %v1585_v47 = vpop.f32.mrf.mxu0  ;;  %1717 = vmatmul.f32.gmra.mxu2 %v1097_v43  ;;  %v1125_v43 = vld [vmem:[#allocation3 + $0x3f8] sm:$0xff] }
 0x2bc   : > { %v3475_v62 = vadd.f32 %v1585_v47, %v1521_v5  ;;  %1652 = vmatmul.f32.gmra.mxu1 %v1096_v46 }
 0x2be   : > { %1782 = vmatmul.f32.gmra.mxu3 %v1098_v48  ;;  %1844 = vmatmul.f32.gmra.mxu0 %v1090_v49  ;;  %v1458_v52 = vpop.f32.mrf.mxu2  ;;  %v1553_v49 = vadd.f32 %v3421_v55, %v3418_v53 }
 0x2bf   : > { %v1459_v54 = vadd.f32 %v1458_v52, %v1394_v36  ;;  %v1126_v52 = vld [vmem:[#allocation3 + $0x60] sm:$0xff] }
 0x2c1   : > { %v1396_v57 = vpop.f32.mrf.mxu1  ;;  %v1523_v58 = vpop.f32.mrf.mxu3 }
 0x2c2   : > { %v1397_v61 = vadd.f32 %v1396_v57, %v1332_v8  ;;  %v1524_v63 = vadd.f32 %v1523_v58, %v1459_v54 }
 0x2c3   : > { %v1588_v9 = vpop.f32.mrf.mxu0  ;;  %1720 = vmatmul.f32.gmra.mxu2 %v1106_v56 }
 0x2c4   : > { %v3479_v6 = vadd.f32 %v1588_v9, %v1524_v63  ;;  %1655 = vmatmul.f32.gmra.mxu1 %v1105_v60  ;;  %v1556_v63 = vadd.f32 %v3426_v4, %v3423_v2 }
 0x2c6   : > { %1785 = vmatmul.f32.gmra.mxu3 %v1107_v14  ;;  %1847 = vmatmul.f32.gmra.mxu0 %v1099_v3  ;;  %v1461_v7 = vpop.f32.mrf.mxu2 }
 0x2c7   : > { %v1462_v10 = vadd.f32 %v1461_v7, %v1397_v61 }
 0x2c9   : > { %v1399_v12 = vpop.f32.mrf.mxu1  ;;  %v1526_v17 = vpop.f32.mrf.mxu3 }
 0x2ca   : > { %v1400_v15 = vadd.f32 %v1399_v12, %v3409_v29  ;;  %v1527_v16 = vadd.f32 %v1526_v17, %v1462_v10  ;;  %v1559_v12 = vadd.f32 %v3431_v23, %v3428_v20 }
 0x2cb   : > { %v1591_v18 = vpop.f32.mrf.mxu0  ;;  %1723 = vmatmul.f32.gmra.mxu2 %v1115_v11 }
 0x2cc   : > { %v3482_v27 = vadd.f32 %v1591_v18, %v1527_v16  ;;  %1658 = vmatmul.f32.gmra.mxu1 %v1114_v21 }
 0x2ce   : > { %1788 = vmatmul.f32.gmra.mxu3 %v1116_v24  ;;  %1850 = vmatmul.f32.gmra.mxu0 %v1108_v25  ;;  %v1464_v30 = vpop.f32.mrf.mxu2  ;;  %v1562_v25 = vadd.f32 %v3437_v40, %v3433_v37 }
 0x2cf   : > { %v1465_v31 = vadd.f32 %v1464_v30, %v1400_v15 }
 0x2d1   : > { %v1402_v32 = vpop.f32.mrf.mxu1  ;;  %v1529_v33 = vpop.f32.mrf.mxu3 }
 0x2d2   : > { %v1403_v38 = vadd.f32 %v1402_v32, %v3415_v39  ;;  %v1530_v41 = vadd.f32 %v1529_v33, %v1465_v31 }
 0x2d3   : > { %v1594_v29 = vpop.f32.mrf.mxu0  ;;  %1726 = vmatmul.f32.gmra.mxu2 %v1124_v26 }
 0x2d4   : > { %v3485_v45 = vadd.f32 %v1594_v29, %v1530_v41  ;;  %1661 = vmatmul.f32.gmra.mxu1 %v1123_v35 }
 0x2d6   : > { %1791 = vmatmul.f32.gmra.mxu3 %v1125_v43  ;;  %1853 = vmatmul.f32.gmra.mxu0 %v1117_v44  ;;  %v1467_v46 = vpop.f32.mrf.mxu2 }
 0x2d7   : > { %v1468_v36 = vadd.f32 %v1467_v46, %v1403_v38  ;;  %v1565_v38 = vadd.f32 %v3443_v51, %v3439_v50 }
 0x2d9   : > { %v1532_v5 = vpop.f32.mrf.mxu3  ;;  %v1617_v47 = vpop.f32.mrf.mxu1 }
 0x2da   : > { %v1533_v48 = vadd.f32 %v1532_v5, %v1468_v36  ;;  %v1618_v8 = vadd.f32 %v1617_v47, %v1553_v49  ;;  %v1568_v5 = vadd.f32 %v3449_v1, %v3445_v0 }
 0x2db   : > { %v1597_v39 = vpop.f32.mrf.mxu0 }
 0x2dc   : > { %v3489_v54 = vadd.f32 %v1597_v39, %v1533_v48 }
 0x2de   : > { %1856 = vmatmul.f32.gmra.mxu0 %v1126_v52  ;;  %v1682_v56 = vpop.f32.mrf.mxu2 }
 0x2df   : > { %v1683_v57 = vadd.f32 %v1682_v56, %v1618_v8  ;;  %v1571_v56 = vadd.f32 %v3455_v22, %v3451_v19 }
 0x2e1   : > { %v1620_v58 = vpop.f32.mrf.mxu1  ;;  %v1747_v60 = vpop.f32.mrf.mxu3 }
 0x2e2   : > { %v1748_v61 = vadd.f32 %v1747_v60, %v1683_v57  ;;  %v1621_v3 = vadd.f32 %v1620_v58, %v1556_v63 }
 0x2e3   : > { %v1812_v9 = vpop.f32.mrf.mxu0 }
 0x2e4   : > { %v1813_v14 = vadd.f32 %v1812_v9, %v1748_v61 }
 0x2e6   : > { %1860 = vst [vmem:[%s2427_s11] sm:$0xff] %v1813_v14  ;;  %v1685_v53 = vpop.f32.mrf.mxu2  ;;  %v1574_v14 = vadd.f32 %v3461_v42, %v3459_v28 }
 0x2e7   : > { %v1686_v55 = vadd.f32 %v1685_v53, %v1621_v3 }
 0x2e9   : > { %v1623_v7 = vpop.f32.mrf.mxu1  ;;  %v1750_v10 = vpop.f32.mrf.mxu3 }
 0x2ea   : > { %v1751_v11 = vadd.f32 %v1750_v10, %v1686_v55  ;;  %v1624_v15 = vadd.f32 %v1623_v7, %v1559_v12 }
 0x2eb   : > { %v1815_v17 = vpop.f32.mrf.mxu0 }
 0x2ec   : > { %v1816_v21 = vadd.f32 %v1815_v17, %v1751_v11 }
 0x2ee   : > { %1861 = vst [vmem:[%s2427_s11 + $0x8] sm:$0xff] %v1816_v21  ;;  %v1688_v16 = vpop.f32.mrf.mxu2 }
 0x2ef   : > { %v1689_v18 = vadd.f32 %v1688_v16, %v1624_v15 }
 0x2f1   : > { %v1626_v2 = vpop.f32.mrf.mxu1  ;;  %v1753_v4 = vpop.f32.mrf.mxu3 }
 0x2f2   : > { %v1754_v24 = vadd.f32 %v1753_v4, %v1689_v18  ;;  %v1627_v26 = vadd.f32 %v1626_v2, %v1562_v25 }
 0x2f3   : > { %v1818_v30 = vpop.f32.mrf.mxu0 }
 0x2f4   : > { %v1819_v31 = vadd.f32 %v1818_v30, %v1754_v24 }
 0x2f6   : > { %1862 = vst [vmem:[%s2427_s11 + $0x10] sm:$0xff] %v1819_v31  ;;  %v1691_v32 = vpop.f32.mrf.mxu2 }
 0x2f7   : > { %v1692_v33 = vadd.f32 %v1691_v32, %v1627_v26 }
 0x2f9   : > { %v1629_v20 = vpop.f32.mrf.mxu1  ;;  %v1756_v23 = vpop.f32.mrf.mxu3 }
 0x2fa   : > { %v1757_v35 = vadd.f32 %v1756_v23, %v1692_v33  ;;  %v1630_v43 = vadd.f32 %v1629_v20, %v1565_v38 }
 0x2fb   : > { %v1821_v41 = vpop.f32.mrf.mxu0 }
 0x2fc   : > { %v1822_v29 = vadd.f32 %v1821_v41, %v1757_v35 }
 0x2fe   : > { %1863 = vst [vmem:[%s2427_s11 + $0x18] sm:$0xff] %v1822_v29  ;;  %v1694_v44 = vpop.f32.mrf.mxu2 }
 0x2ff   : > { %v1695_v46 = vadd.f32 %v1694_v44, %v1630_v43 }
 0x301   : > { %v1632_v37 = vpop.f32.mrf.mxu1  ;;  %v1759_v40 = vpop.f32.mrf.mxu3 }
 0x302   : > { %v1760_v36 = vadd.f32 %v1759_v40, %v1695_v46  ;;  %v1633_v49 = vadd.f32 %v1632_v37, %v1568_v5 }
 0x303   : > { %v1824_v47 = vpop.f32.mrf.mxu0 }
 0x304   : > { %v1825_v48 = vadd.f32 %v1824_v47, %v1760_v36 }
 0x306   : > { %1864 = vst [vmem:[%s2427_s11 + $0x20] sm:$0xff] %v1825_v48  ;;  %v1697_v39 = vpop.f32.mrf.mxu2 }
 0x307   : > { %v1698_v52 = vadd.f32 %v1697_v39, %v1633_v49 }
 0x309   : > { %v1635_v50 = vpop.f32.mrf.mxu1  ;;  %v1762_v51 = vpop.f32.mrf.mxu3 }
 0x30a   : > { %v1763_v8 = vadd.f32 %v1762_v51, %v1698_v52  ;;  %v1636_v60 = vadd.f32 %v1635_v50, %v1571_v56 }
 0x30b   : > { %v1827_v57 = vpop.f32.mrf.mxu0 }
 0x30c   : > { %v1828_v58 = vadd.f32 %v1827_v57, %v1763_v8 }
 0x30e   : > { %1865 = vst [vmem:[%s2427_s11 + $0x28] sm:$0xff] %v1828_v58  ;;  %v1700_v61 = vpop.f32.mrf.mxu2 }
 0x30f   : > { %v1701_v63 = vadd.f32 %v1700_v61, %v1636_v60 }
 0x311   : > { %v1638_v0 = vpop.f32.mrf.mxu1  ;;  %v1765_v1 = vpop.f32.mrf.mxu3 }
 0x312   : > { %v1766_v9 = vadd.f32 %v1765_v1, %v1701_v63  ;;  %v1639_v55 = vadd.f32 %v1638_v0, %v1574_v14 }
 0x313   : > { %v1830_v3 = vpop.f32.mrf.mxu0 }
 0x314   : > { %v1831_v53 = vadd.f32 %v1830_v3, %v1766_v9 }
 0x316   : > { %1866 = vst [vmem:[%s2427_s11 + $0x30] sm:$0xff] %v1831_v53  ;;  %v1703_v7 = vpop.f32.mrf.mxu2 }
 0x317   : > { %v1704_v10 = vadd.f32 %v1703_v7, %v1639_v55 }
 0x319   : > { %v1641_v19 = vpop.f32.mrf.mxu1  ;;  %v1768_v22 = vpop.f32.mrf.mxu3 }
 0x31a   : > { %v1769_v11 = vadd.f32 %v1768_v22, %v1704_v10  ;;  %v1642_v21 = vadd.f32 %v1641_v19, %v3465_v59 }
 0x31b   : > { %v1833_v12 = vpop.f32.mrf.mxu0 }
 0x31c   : > { %v1834_v17 = vadd.f32 %v1833_v12, %v1769_v11 }
 0x31e   : > { %1867 = vst [vmem:[%s2427_s11 + $0x38] sm:$0xff] %v1834_v17  ;;  %v1706_v15 = vpop.f32.mrf.mxu2 }
 0x31f   : > { %v1707_v16 = vadd.f32 %v1706_v15, %v1642_v21 }
 0x321   : > { %v1644_v18 = vpop.f32.mrf.mxu1  ;;  %v1771_v28 = vpop.f32.mrf.mxu3 }
 0x322   : > { %v1772_v42 = vadd.f32 %v1771_v28, %v1707_v16  ;;  %v1645_v24 = vadd.f32 %v1644_v18, %v3468_v13 }
 0x323   : > { %v1836_v2 = vpop.f32.mrf.mxu0 }
 0x324   : > { %v1837_v4 = vadd.f32 %v1836_v2, %v1772_v42 }
 0x326   : > { %1868 = vst [vmem:[%s2427_s11 + $0x40] sm:$0xff] %v1837_v4  ;;  %v1709_v25 = vpop.f32.mrf.mxu2 }
 0x327   : > { %v1710_v30 = vadd.f32 %v1709_v25, %v1645_v24 }
 0x329   : > { %v1647_v31 = vpop.f32.mrf.mxu1  ;;  %v1774_v26 = vpop.f32.mrf.mxu3 }
 0x32a   : > { %v1775_v32 = vadd.f32 %v1774_v26, %v1710_v30  ;;  %v1648_v20 = vadd.f32 %v1647_v31, %v3471_v34 }
 0x32b   : > { %v1839_v33 = vpop.f32.mrf.mxu0 }
 0x32c   : > { %v1840_v59 = vadd.f32 %v1839_v33, %v1775_v32 }
 0x32e   : > { %1869 = vst [vmem:[%s2427_s11 + $0x48] sm:$0xff] %v1840_v59  ;;  %v1712_v23 = vpop.f32.mrf.mxu2 }
 0x32f   : > { %v1713_v35 = vadd.f32 %v1712_v23, %v1648_v20 }
 0x331   : > { %v1650_v38 = vpop.f32.mrf.mxu1  ;;  %v1777_v41 = vpop.f32.mrf.mxu3 }
 0x332   : > { %v1778_v29 = vadd.f32 %v1777_v41, %v1713_v35  ;;  %v1651_v44 = vadd.f32 %v1650_v38, %v3475_v62 }
 0x333   : > { %v1842_v43 = vpop.f32.mrf.mxu0 }
 0x334   : > { %v1843_v13 = vadd.f32 %v1842_v43, %v1778_v29 }
 0x336   : > { %1870 = vst [vmem:[%s2427_s11 + $0x50] sm:$0xff] %v1843_v13  ;;  %v1715_v46 = vpop.f32.mrf.mxu2 }
 0x337   : > { %v1716_v37 = vadd.f32 %v1715_v46, %v1651_v44 }
 0x339   : > { %v1653_v40 = vpop.f32.mrf.mxu1  ;;  %v1780_v36 = vpop.f32.mrf.mxu3 }
 0x33a   : > { %v1781_v5 = vadd.f32 %v1780_v36, %v1716_v37  ;;  %v1654_v48 = vadd.f32 %v1653_v40, %v3479_v6 }
 0x33b   : > { %v1845_v47 = vpop.f32.mrf.mxu0 }
 0x33c   : > { %v1846_v34 = vadd.f32 %v1845_v47, %v1781_v5 }
 0x33e   : > { %1871 = vst [vmem:[%s2427_s11 + $0x58] sm:$0xff] %v1846_v34  ;;  %v1718_v49 = vpop.f32.mrf.mxu2 }
 0x33f   : > { %v1719_v39 = vadd.f32 %v1718_v49, %v1654_v48 }
 0x341   : > { %v1656_v52 = vpop.f32.mrf.mxu1  ;;  %v1783_v50 = vpop.f32.mrf.mxu3 }
 0x342   : > { %v1784_v62 = vadd.f32 %v1783_v50, %v1719_v39  ;;  %v1657_v56 = vadd.f32 %v1656_v52, %v3482_v27 }
 0x343   : > { %v1848_v51 = vpop.f32.mrf.mxu0 }
 0x344   : > { %v1849_v8 = vadd.f32 %v1848_v51, %v1784_v62 }
 0x346   : > { %1872 = vst [vmem:[%s2427_s11 + $0x60] sm:$0xff] %v1849_v8  ;;  %v1721_v57 = vpop.f32.mrf.mxu2 }
 0x347   : > { %v1722_v58 = vadd.f32 %v1721_v57, %v1657_v56 }
 0x349   : > { %v1659_v60 = vpop.f32.mrf.mxu1  ;;  %v1786_v61 = vpop.f32.mrf.mxu3 }
 0x34a   : > { %v1787_v63 = vadd.f32 %v1786_v61, %v1722_v58  ;;  %v1660_v1 = vadd.f32 %v1659_v60, %v3485_v45 }
 0x34b   : > { %v1851_v6 = vpop.f32.mrf.mxu0 }
 0x34c   : > { %v1852_v0 = vadd.f32 %v1851_v6, %v1787_v63 }
 0x34e   : > { %1873 = vst [vmem:[%s2427_s11 + $0x68] sm:$0xff] %v1852_v0  ;;  %v1724_v9 = vpop.f32.mrf.mxu2 }
 0x34f   : > { %v1725_v14 = vadd.f32 %v1724_v9, %v1660_v1 }
 0x351   : > { %v1789_v3 = vpop.f32.mrf.mxu3  ;;  %v1662_v27 = vpop.f32.mrf.mxu1 }
 0x352   : > { %v1790_v53 = vadd.f32 %v1789_v3, %v1725_v14  ;;  %v1663_v10 = vadd.f32 %v1662_v27, %v3489_v54 }
 0x353   : > { %v1854_v55 = vpop.f32.mrf.mxu0 }
 0x354   : > { %v1855_v7 = vadd.f32 %v1854_v55, %v1790_v53 }
 0x356   : > { %1874 = vst [vmem:[%s2427_s11 + $0x70] sm:$0xff] %v1855_v7  ;;  %v1727_v45 = vpop.f32.mrf.mxu2 }
 0x357   : > { %v1728_v19 = vadd.f32 %v1727_v45, %v1663_v10 }
 0x359   : > { %v1792_v22 = vpop.f32.mrf.mxu3 }
 0x35a   : > { %v1793_v11 = vadd.f32 %v1792_v22, %v1728_v19 }
 0x35b   : > { %v1857_v12 = vpop.f32.mrf.mxu0 }
 0x35c   : > { %v1858_v17 = vadd.f32 %v1857_v12, %v1793_v11 }
 0x35e   : > { %1875 = vst [vmem:[%s2427_s11 + $0x78] sm:$0xff] %v1858_v17 }
 0x35f   : > { %2255 = shalt.err (!%p2252_p12)
}
 0x360   : > { %s2326_s4 = smov 128   ;;  %s2327_s11 = smov 8  }
 0x361   : > { %2154 = dma.vmem_to_hbm [thread:$0]  (%p2399_p3), %s1894_s20, 2048, %s1896_s21, %s1877_s24, %s2326_s4, %s2326_s4, %s2327_s11  }
 0x362 PF: > { %p2160_p13 = scmp.ge.s32.totalorder %s2324_s19, 2  ;;  %s1910_s8 = sand.u32 1, %s2296_s12  }
 0x363   : > { %s1911_s9 = scalar_lea.sflag [#allocation6], %s1910_s8 }
 0x364   : > { %p2157_p0 = pnand %p2160_p13, %p2408_p8 }
 0x366   : > { %p2158_p1 = pneg %p2157_p0 }
 0x368   : > { %2291 = dma.done.wait (%p2158_p1), %s1911_s9, 2048  }
 0x369   : > { %2293 = vsyncadd (%p2158_p1), %s1911_s9, 4294965248  ;;  %s16_s19 = sadd.s32 1, %s2324_s19   ;;  %s3581_s12 = smov %s2300_s13 }
 0x36a   : > { %p13_p2 = scmp.ge.s32.totalorder %s16_s19, 6   ;;  %s3582_s13 = smov %s2304_s14 }
 0x36b   : > { %s3583_s14 = smov %s2417_s30  ;;  %s3584_s15 = smov %s2316_s17 }
 0x36c   : > { %s3585_s16 = smov %s2320_s18  ;;  %s3586_s17 = smov %s3589_s22 }
 0x36d   : > { %s3587_s18 = smov %s3593_s23  ;;  %15 = sbr.rel (!%p13_p2) target bundleno = 5 (0x5), region = 161 }
 0x372   :  { %1917 = vsyncpa [#allocation6], 1 }
 0x373   :  { %1919 = vsyncpa [#allocation6 + $0x1], 1 }
 0x374   :  { %1920 = vsyncmov [#allocation4] }
 0x377   :  { %s1921_s25 = vpop.sfrf %1920 }
 0x378   :  { %p2103_p3 = scmp.ne.s32.totalorder %s1921_s25, 0 }
 0x37a   :  { %1925 = shalt.err (%p2103_p3)  }
 0x37b   :  { %1927 = vsyncmov [#allocation4 + $0x1] }
 0x37e   :  { %s1928_s26 = vpop.sfrf %1927 }
 0x37f   :  { %p2104_p8 = scmp.ne.s32.totalorder %s1928_s26, 0 }
 0x381   :  { %1932 = shalt.err (%p2104_p8)  }

</bundles_post_ra>
